<compile_context>
chip_gen: v6e
topology: v6e:2x2x1
jax: 0.10.0
libtpu: 0.0.40
codegen_flags: <defaults>
</compile_context>

<pallas_src>
import jax
import jax.numpy as jnp
from jax import lax
from jax.experimental import pallas as pl
from jax.experimental.pallas import tpu as pltpu

OUTPUT_SIZE = 7


def _make_aap1d_kernel(length, output_size, window):
    inv_window = 1.0 / float(window)

    def kernel(x_ref, o_ref):
        # x_ref: (TR, L) slab of rows; build the (L, OUT) 0/1 membership mask
        # in-kernel (compile-time-constant pattern, trivially hidden under the
        # input DMA), then one MXU dot per slab.
        l_idx = lax.broadcasted_iota(jnp.int32, (length, output_size), 0)
        o_idx = lax.broadcasted_iota(jnp.int32, (length, output_size), 1)
        in_win = (l_idx >= o_idx * window) & (l_idx < (o_idx + 1) * window)
        w = in_win.astype(x_ref.dtype)  # exact 0/1 mask in the input dtype
        acc = jnp.dot(x_ref[...], w, preferred_element_type=jnp.float32)
        o_ref[...] = (acc * inv_window).astype(o_ref.dtype)

    return kernel


def adaptive_avg_pool1d(x, output_size=OUTPUT_SIZE, num_steps=2):
    """x: (N, C, L) -> (N, C, output_size); requires L % output_size == 0."""
    n, c, length = x.shape
    assert length % output_size == 0, "StaticEvenMultiple requires L % out == 0"
    window = length // output_size
    rows = n * c

    # Collapse batch and channel into one long row axis (layout plumbing only).
    x2 = x.reshape(rows, length)

    # Row tile: aim for `num_steps` grid steps (an even count keeps v7x's two
    # TensorCores balanced; on single-TC parts 2 steps is within ~0.35us of
    # optimal). Multiple of 8 sublanes; no wrapper-side padding -- Pallas
    # handles a ragged last block and the op is row-independent.
    tr = -(-rows // num_steps)          # cdiv(rows, num_steps)
    tr = -(-tr // 8) * 8                # round up to a sublane multiple
    tr = min(tr, -(-rows // 8) * 8)     # never exceed the (8-padded) row count
    grid = (pl.cdiv(rows, tr),)

    itemsize = jnp.dtype(x.dtype).itemsize
    cost = pl.CostEstimate(
        flops=2 * rows * length * output_size,
        transcendentals=0,
        bytes_accessed=rows * length * itemsize + rows * output_size * itemsize,
    )

    kernel = _make_aap1d_kernel(length, output_size, window)

    out = pl.pallas_call(
        kernel,
        out_shape=jax.ShapeDtypeStruct((rows, output_size), x.dtype),
        grid_spec=pltpu.PrefetchScalarGridSpec(
            num_scalar_prefetch=0,
            grid=grid,
            in_specs=[pl.BlockSpec((tr, length), lambda r: (r, 0))],
            out_specs=pl.BlockSpec((tr, output_size), lambda r: (r, 0)),
        ),
        compiler_params=pltpu.CompilerParams(
            dimension_semantics=("parallel",),
        ),
        cost_estimate=cost,
    )(x2)

    return out.reshape(n, c, output_size)


def _reference(x, output_size=OUTPUT_SIZE):
    # Pure-JAX reference of PyTorch AdaptiveAvgPool1d semantics.
    n, c, length = x.shape
    cols = []
    for i in range(output_size):
        start = (i * length) // output_size
        end = -((-(i + 1) * length) // output_size)
        cols.append(jnp.mean(x[:, :, start:end], axis=-1, keepdims=True))
    return jnp.concatenate(cols, axis=-1)


if __name__ == "__main__":
    key = jax.random.PRNGKey(0)
    # Static shape from the module's annotate_args: [5, 512, 147] float32.
    x = jax.random.normal(key, (5, 512, 147), dtype=jnp.float32)

    out = adaptive_avg_pool1d(x)
    out = jax.block_until_ready(out)

    ref = _reference(x)
    assert out.shape == (5, 512, OUTPUT_SIZE), out.shape
    assert jnp.allclose(out, ref, atol=1e-5, rtol=1e-5), "mismatch vs reference"

    print("KERNEL_OK")
</pallas_src>

<mosaic_0001>
module attributes {stable_mosaic.version = 11 : i64} {
  func.func @kernel(%arg0: i32, %arg1: memref<1280x147xf32, #tpu.memory_space<vmem>>, %arg2: memref<1280x7xf32, #tpu.memory_space<vmem>>) attributes {dimension_semantics = [#tpu.dimension_semantics<parallel>], iteration_bounds = array<i64: 2>, scalar_prefetch = 0 : i64, scratch_operands = 0 : i64, tpu.core_type = #tpu.core_type<tc>, window_params = [{transform_indices = @transform_0, window_bounds = array<i64: 1280, 147>}, {transform_indices = @transform_1, window_bounds = array<i64: 1280, 7>}]} {
    %0 = tpu.iota {dimensions = array<i32: 0>} : vector<147x7xi32>
    %1 = tpu.iota {dimensions = array<i32: 1>} : vector<147x7xi32>
    %c21_i32 = arith.constant 21 : i32
    %2 = vector.broadcast %c21_i32 : i32 to vector<147x7xi32>
    %3 = arith.muli %1, %2 : vector<147x7xi32>
    %4 = arith.cmpi sge, %0, %3 : vector<147x7xi32>
    %c1_i32 = arith.constant 1 : i32
    %5 = vector.broadcast %c1_i32 : i32 to vector<147x7xi32>
    %6 = arith.addi %1, %5 : vector<147x7xi32>
    %c21_i32_0 = arith.constant 21 : i32
    %7 = vector.broadcast %c21_i32_0 : i32 to vector<147x7xi32>
    %8 = arith.muli %6, %7 : vector<147x7xi32>
    %9 = arith.cmpi slt, %0, %8 : vector<147x7xi32>
    %10 = arith.andi %4, %9 : vector<147x7xi1>
    %11 = arith.extui %10 : vector<147x7xi1> to vector<147x7xi32>
    %12 = arith.sitofp %11 : vector<147x7xi32> to vector<147x7xf32>
    %c0 = arith.constant 0 : index
    %c0_1 = arith.constant 0 : index
    %13 = vector.load %arg1[%c0, %c0_1] : memref<1280x147xf32, #tpu.memory_space<vmem>>, vector<1280x147xf32>
    %cst = arith.constant dense<0.000000e+00> : vector<1280x7xf32>
    %14 = tpu.matmul %13, %12, %cst {dimension_numbers = #tpu.dot_dimension_numbers<[1], [0], [0], [1], [0, 0, 1, 1], [], []>} : vector<1280x147xf32>, vector<147x7xf32>, vector<1280x7xf32> -> vector<1280x7xf32>
    %cst_2 = arith.constant 0.0476190485 : f32
    %15 = vector.broadcast %cst_2 : f32 to vector<1280x7xf32>
    %16 = arith.mulf %14, %15 : vector<1280x7xf32>
    %c0_3 = arith.constant 0 : index
    %c0_4 = arith.constant 0 : index
    %17 = vector.load %arg2[%c0_3, %c0_4] : memref<1280x7xf32, #tpu.memory_space<vmem>>, vector<1280x7xf32>
    tpu.vector_store %arg2[%c0_3, %c0_4], %16 {strides = array<i32>} : memref<1280x7xf32, #tpu.memory_space<vmem>>, vector<1280x7xf32>,
    return
  }
  func.func @transform_0(%arg0: i32) -> (i32, i32) {
    %c0_i32 = arith.constant 0 : i32
    %c0_i32_0 = arith.constant 0 : i32
    return %arg0, %c0_i32 : i32, i32
  }
  func.func @transform_1(%arg0: i32) -> (i32, i32) {
    %c0_i32 = arith.constant 0 : i32
    %c0_i32_0 = arith.constant 0 : i32
    return %arg0, %c0_i32 : i32, i32
  }
}

</mosaic_0001>

<bundles_post_ra>
// kernel: tpu_custom_call.1
= control target key start
LH: loop header
LB: loop body
LE: loop exit
PB: predicated region body
PF: predicated region fallthrough
CT: control target
= control target key end

     0   :  { %s2567_s6 = smov 0   ;;  %s3531_s0 = inlined_call_operand.vmem [shape: f32[2560,147], index: 0, kind: input, shape index: {}]   ;;  %s3532_s1 = inlined_call_operand.vmem [shape: f32[2560,7], index: 1, kind: output, shape index: {}]  }
   0x1 LB: > { %s2290_s7 = sadd.s32 4294967295, %s2553_s6   ;;  %p2294_p0 = scmp.ge.s32.totalorder %s2553_s6, 1  ;;  %s2553_s6 = sphi %s2567_s6, %s11_s6  }
   0x2   : > { %p89_p1 = scmp.lt.s32.totalorder %s2553_s6, 3 }
   0x4   : > { %p90_p2 = pnand %p2294_p0, %p89_p1 }
   0x5   : > { %s110_s8 = smul.u32 (!%p90_p2), 160, %s2290_s7 }
   0x6   : > { %93 = sbr.rel (%p90_p2) target bundleno = 570 (0x23a), region = 24 }
   0x7   : > { %p111_p3 = scmp.lt.s32.totalorder (!%p90_p2), %s110_s8, 319 }
   0xb   : > { %v123_v0 = vlaneseq  ;;  %v2555_v1 = vmov 0.0   ;;  %s3534_s8 = smov (!%p111_p3, %s110_s8), 319  ;;  %vm563_vm1 = vcmask 154624   ;;  %v2556_v13 = vmov 1.0  }
   0xc   : > { %1048 = vmatprep.subr.mxu0 %v2555_v1  ;;  %2499 = vmatprep.subr.mxu1 %v2555_v1  ;;  %s2498_s9 = sshll.u32 %s3534_s8, 4  ;;  %s2297_s13 = sshll.u32 %s3534_s8, 3 }
   0xd   : > { %v2577_v2 = vshrl.u32 %v123_v0, 7  ;;  %v144_v3 = vand.u32 127, %v123_v0  ;;  %s2596_s12 = scalar_lea.vmem %s3531_s0, %s2498_s9  ;;  %s3022_s16 = scalar_lea.vmem %s3532_s1, %s2297_s13 }
   0xe   : > { %v244_v12 = vld [vmem:[%s2596_s12 + $0x8] sm:$0xff]  ;;  %v243_v29 = vld [vmem:[%s2596_s12] sm:$0xff]  ;;  %v246_v31 = vld [vmem:[%s2596_s12 + $0x18] sm:$0xff] }
   0xf   : > { %v139_v4 = vadd.s32 120, %v2577_v2  ;;  %v2580_v5 = vmul.u32 21, %v144_v3  ;;  %v165_v6 = vadd.s32 1, %v144_v3  ;;  %v138_v7 = vadd.s32 112, %v2577_v2  ;;  %2336 = vmatprep.mubr.msk.f32.mxu0 %vm563_vm1, %v244_v12  ;;  %v404_v28 = vld [vmem:[%s2596_s12 + $0x508] sm:$0xff]  ;;  %v403_v30 = vld [vmem:[%s2596_s12 + $0x500] sm:$0xff] }
  0x10   : > { %v137_v8 = vadd.s32 104, %v2577_v2  ;;  %v136_v10 = vadd.s32 96, %v2577_v2  ;;  %v135_v11 = vadd.s32 88, %v2577_v2  ;;  %v134_v14 = vadd.s32 80, %v2577_v2  ;;  %v406_v32 = vld [vmem:[%s2596_s12 + $0x518] sm:$0xff]  ;;  %2416 = vmatprep.mubr.msk.f32.mxu1 %vm563_vm1, %v404_v28  ;;  %v245_v33 = vld [vmem:[%s2596_s12 + $0x10] sm:$0xff] }
  0x11   : > { %vm161_vm0 = vcmp.ge.s32.totalorder %v139_v4, %v2580_v5  ;;  %v2587_v9 = vmul.u32 21, %v165_v6  ;;  %vm160_vm2 = vcmp.ge.s32.totalorder %v138_v7, %v2580_v5  ;;  %v133_v15 = vadd.s32 72, %v2577_v2  ;;  %v405_v34 = vld [vmem:[%s2596_s12 + $0x510] sm:$0xff]  ;;  %v248_v35 = vld [vmem:[%s2596_s12 + $0x28] sm:$0xff]  ;;  %v247_v37 = vld [vmem:[%s2596_s12 + $0x20] sm:$0xff] }
  0x12   : > { %vm159_vm5 = vcmp.ge.s32.totalorder %v137_v8, %v2580_v5  ;;  %vm158_vm9 = vcmp.ge.s32.totalorder %v136_v10, %v2580_v5  ;;  %vm157_vm12 = vcmp.ge.s32.totalorder %v135_v11, %v2580_v5  ;;  %vm156_vm15 = vcmp.ge.s32.totalorder %v134_v14, %v2580_v5  ;;  %v408_v36 = vld [vmem:[%s2596_s12 + $0x528] sm:$0xff]  ;;  %v407_v38 = vld [vmem:[%s2596_s12 + $0x520] sm:$0xff]  ;;  %v250_v39 = vld [vmem:[%s2596_s12 + $0x38] sm:$0xff] }
  0x13   : > { %vm182_vm3 = vcmp.lt.s32.totalorder %v139_v4, %v2587_v9  ;;  %vm181_vm4 = vcmp.lt.s32.totalorder %v138_v7, %v2587_v9  ;;  %vm180_vm6 = vcmp.lt.s32.totalorder %v137_v8, %v2587_v9  ;;  %vm179_vm10 = vcmp.lt.s32.totalorder %v136_v10, %v2587_v9  ;;  %v410_v40 = vld [vmem:[%s2596_s12 + $0x538] sm:$0xff]  ;;  %v249_v41 = vld [vmem:[%s2596_s12 + $0x30] sm:$0xff]  ;;  %v252_v43 = vld [vmem:[%s2596_s12 + $0x48] sm:$0xff] }
  0x14   : > { %vm201_vm7 = vmand %vm161_vm0, %vm182_vm3  ;;  %vm178_vm13 = vcmp.lt.s32.totalorder %v135_v11, %v2587_v9  ;;  %vm177_vm0 = vcmp.lt.s32.totalorder %v134_v14, %v2587_v9  ;;  %v132_v16 = vadd.s32 64, %v2577_v2  ;;  %vm155_vm3 = vcmp.ge.s32.totalorder %v133_v15, %v2580_v5  ;;  %v409_v42 = vld [vmem:[%s2596_s12 + $0x530] sm:$0xff]  ;;  %v412_v44 = vld [vmem:[%s2596_s12 + $0x548] sm:$0xff] }
  0x15   : > { %2317 = vmatpush1.msk.msra.mxu0 %vm201_vm7, %v2556_v13  ;;  %2518 = vmatpush1.msk.msra.mxu1 %vm201_vm7, %v2556_v13  ;;  %vm200_vm8 = vmand %vm160_vm2, %vm181_vm4  ;;  %vm176_vm4 = vcmp.lt.s32.totalorder %v133_v15, %v2587_v9  ;;  %v131_v17 = vadd.s32 56, %v2577_v2  ;;  %v130_v18 = vadd.s32 48, %v2577_v2  ;;  %v129_v19 = vadd.s32 40, %v2577_v2  ;;  %v251_v45 = vld [vmem:[%s2596_s12 + $0x40] sm:$0xff]  ;;  %v254_v47 = vld [vmem:[%s2596_s12 + $0x58] sm:$0xff] }
  0x16   : > { %1050 = vmatprep.subr.mxu0 %v2555_v1  ;;  %2500 = vmatprep.subr.mxu1 %v2555_v1  ;;  %vm199_vm11 = vmand %vm159_vm5, %vm180_vm6  ;;  %vm154_vm6 = vcmp.ge.s32.totalorder %v132_v16, %v2580_v5  ;;  %vm175_vm7 = vcmp.lt.s32.totalorder %v132_v16, %v2587_v9  ;;  %v128_v20 = vadd.s32 32, %v2577_v2  ;;  %v127_v21 = vadd.s32 24, %v2577_v2  ;;  %v411_v46 = vld [vmem:[%s2596_s12 + $0x540] sm:$0xff]  ;;  %v414_v48 = vld [vmem:[%s2596_s12 + $0x558] sm:$0xff] }
  0x17   : > { %2318 = vmatpush1.msk.msra.mxu0 %vm200_vm8, %v2556_v13  ;;  %2519 = vmatpush1.msk.msra.mxu1 %vm200_vm8, %v2556_v13  ;;  %vm198_vm14 = vmand %vm158_vm9, %vm179_vm10  ;;  %vm153_vm9 = vcmp.ge.s32.totalorder %v131_v17, %v2580_v5  ;;  %vm174_vm10 = vcmp.lt.s32.totalorder %v131_v17, %v2587_v9  ;;  %v126_v22 = vadd.s32 16, %v2577_v2  ;;  %v125_v23 = vadd.s32 8, %v2577_v2  ;;  %v253_v49 = vld [vmem:[%s2596_s12 + $0x50] sm:$0xff]  ;;  %v256_v51 = vld [vmem:[%s2596_s12 + $0x68] sm:$0xff] }
  0x18   : > { %1052 = vmatprep.subr.mxu0 %v2555_v1  ;;  %2501 = vmatprep.subr.mxu1 %v2555_v1  ;;  %vm197_vm2 = vmand %vm157_vm12, %vm178_vm13  ;;  %vm152_vm12 = vcmp.ge.s32.totalorder %v130_v18, %v2580_v5  ;;  %vm173_vm13 = vcmp.lt.s32.totalorder %v130_v18, %v2587_v9  ;;  %v142_v24 = vadd.s32 144, %v2577_v2  ;;  %v141_v25 = vadd.s32 136, %v2577_v2  ;;  %v413_v50 = vld [vmem:[%s2596_s12 + $0x550] sm:$0xff]  ;;  %v416_v52 = vld [vmem:[%s2596_s12 + $0x568] sm:$0xff] }
  0x19   : > { %2319 = vmatpush1.msk.msra.mxu0 %vm199_vm11, %v2556_v13  ;;  %2520 = vmatpush1.msk.msra.mxu1 %vm199_vm11, %v2556_v13  ;;  %vm196_vm5 = vmand %vm156_vm15, %vm177_vm0  ;;  %vm151_vm15 = vcmp.ge.s32.totalorder %v129_v19, %v2580_v5  ;;  %vm172_vm0 = vcmp.lt.s32.totalorder %v129_v19, %v2587_v9  ;;  %v140_v26 = vadd.s32 128, %v2577_v2  ;;  %v255_v53 = vld [vmem:[%s2596_s12 + $0x60] sm:$0xff]  ;;  %v258_v55 = vld [vmem:[%s2596_s12 + $0x78] sm:$0xff] }
  0x1a   : > { %1054 = vmatprep.subr.mxu0 %v2555_v1  ;;  %2502 = vmatprep.subr.mxu1 %v2555_v1  ;;  %vm195_vm8 = vmand %vm155_vm3, %vm176_vm4  ;;  %vm150_vm3 = vcmp.ge.s32.totalorder %v128_v20, %v2580_v5  ;;  %vm171_vm4 = vcmp.lt.s32.totalorder %v128_v20, %v2587_v9  ;;  %v415_v54 = vld [vmem:[%s2596_s12 + $0x560] sm:$0xff]  ;;  %v418_v56 = vld [vmem:[%s2596_s12 + $0x578] sm:$0xff] }
  0x1b   : > { %2320 = vmatpush1.msk.msra.mxu0 %vm198_vm14, %v2556_v13  ;;  %2521 = vmatpush1.msk.msra.mxu1 %vm198_vm14, %v2556_v13  ;;  %vm194_vm11 = vmand %vm154_vm6, %vm175_vm7  ;;  %vm149_vm6 = vcmp.ge.s32.totalorder %v127_v21, %v2580_v5  ;;  %vm170_vm7 = vcmp.lt.s32.totalorder %v127_v21, %v2587_v9  ;;  %v257_v57 = vld [vmem:[%s2596_s12 + $0x70] sm:$0xff]  ;;  %v260_v59 = vld [vmem:[%s2596_s12 + $0x88] sm:$0xff] }
  0x1c   : > { %1056 = vmatprep.subr.mxu0 %v2555_v1  ;;  %2503 = vmatprep.subr.mxu1 %v2555_v1  ;;  %vm193_vm14 = vmand %vm153_vm9, %vm174_vm10  ;;  %vm148_vm9 = vcmp.ge.s32.totalorder %v126_v22, %v2580_v5  ;;  %vm169_vm10 = vcmp.lt.s32.totalorder %v126_v22, %v2587_v9  ;;  %v417_v58 = vld [vmem:[%s2596_s12 + $0x570] sm:$0xff]  ;;  %v420_v60 = vld [vmem:[%s2596_s12 + $0x588] sm:$0xff] }
  0x1d   : > { %2321 = vmatpush1.msk.msra.mxu0 %vm197_vm2, %v2556_v13  ;;  %2522 = vmatpush1.msk.msra.mxu1 %vm197_vm2, %v2556_v13  ;;  %vm192_vm2 = vmand %vm152_vm12, %vm173_vm13  ;;  %vm147_vm12 = vcmp.ge.s32.totalorder %v125_v23, %v2580_v5  ;;  %vm168_vm13 = vcmp.lt.s32.totalorder %v125_v23, %v2587_v9  ;;  %v259_v61 = vld [vmem:[%s2596_s12 + $0x80] sm:$0xff]  ;;  %v262_v63 = vld [vmem:[%s2596_s12 + $0x98] sm:$0xff] }
  0x1e   : > { %1058 = vmatprep.subr.mxu0 %v2555_v1  ;;  %2504 = vmatprep.subr.mxu1 %v2555_v1  ;;  %v419_v62 = vld [vmem:[%s2596_s12 + $0x580] sm:$0xff]  ;;  %v422_v0 = vld [vmem:[%s2596_s12 + $0x598] sm:$0xff]  ;;  %v264_v3 = vld [vmem:[%s2596_s12 + $0xa8] sm:$0xff] }
  0x1f   : > { %2322 = vmatpush1.msk.msra.mxu0 %vm196_vm5, %v2556_v13  ;;  %2523 = vmatpush1.msk.msra.mxu1 %vm196_vm5, %v2556_v13  ;;  %vm191_vm5 = vmand %vm151_vm15, %vm172_vm0  ;;  %vm164_vm15 = vcmp.ge.s32.totalorder %v142_v24, %v2580_v5  ;;  %vm185_vm0 = vcmp.lt.s32.totalorder %v142_v24, %v2587_v9  ;;  %v424_v4 = vld [vmem:[%s2596_s12 + $0x5a8] sm:$0xff]  ;;  %v423_v6 = vld [vmem:[%s2596_s12 + $0x5a0] sm:$0xff] }
  0x20   : > { %1060 = vmatprep.subr.mxu0 %v2555_v1  ;;  %2505 = vmatprep.subr.mxu1 %v2555_v1  ;;  %v266_v7 = vld [vmem:[%s2596_s12 + $0xb8] sm:$0xff]  ;;  %v425_v10 = vld [vmem:[%s2596_s12 + $0x5b0] sm:$0xff]  ;;  %v268_v11 = vld [vmem:[%s2596_s12 + $0xc8] sm:$0xff] }
  0x21   : > { %2323 = vmatpush1.msk.msra.mxu0 %vm195_vm8, %v2556_v13  ;;  %2524 = vmatpush1.msk.msra.mxu1 %vm195_vm8, %v2556_v13  ;;  %vm190_vm8 = vmand %vm150_vm3, %vm171_vm4  ;;  %vm167_vm3 = vcmp.lt.s32.totalorder %v2577_v2, %v2587_v9  ;;  %v426_v8 = vld [vmem:[%s2596_s12 + $0x5b8] sm:$0xff]  ;;  %v428_v12 = vld [vmem:[%s2596_s12 + $0x5c8] sm:$0xff] }
  0x22   : > { %1062 = vmatprep.subr.mxu0 %v2555_v1  ;;  %2506 = vmatprep.subr.mxu1 %v2555_v1  ;;  %vm187_vm4 = vmand %vm147_vm12, %vm168_vm13  ;;  %v427_v14 = vld [vmem:[%s2596_s12 + $0x5c0] sm:$0xff]  ;;  %v270_v15 = vld [vmem:[%s2596_s12 + $0xd8] sm:$0xff] }
  0x23   : > { %2324 = vmatpush1.msk.msra.mxu0 %vm194_vm11, %v2556_v13  ;;  %2525 = vmatpush1.msk.msra.mxu1 %vm194_vm11, %v2556_v13  ;;  %vm189_vm11 = vmand %vm149_vm6, %vm170_vm7  ;;  %vm163_vm7 = vcmp.ge.s32.totalorder %v141_v25, %v2580_v5  ;;  %v430_v16 = vld [vmem:[%s2596_s12 + $0x5d8] sm:$0xff]  ;;  %v269_v17 = vld [vmem:[%s2596_s12 + $0xd0] sm:$0xff] }
  0x24   : > { %1064 = vmatprep.subr.mxu0 %v2555_v1  ;;  %2507 = vmatprep.subr.mxu1 %v2555_v1  ;;  %v429_v18 = vld [vmem:[%s2596_s12 + $0x5d0] sm:$0xff]  ;;  %v272_v19 = vld [vmem:[%s2596_s12 + $0xe8] sm:$0xff]  ;;  %v271_v21 = vld [vmem:[%s2596_s12 + $0xe0] sm:$0xff] }
  0x25   : > { %2325 = vmatpush1.msk.msra.mxu0 %vm193_vm14, %v2556_v13  ;;  %2526 = vmatpush1.msk.msra.mxu1 %vm193_vm14, %v2556_v13  ;;  %vm188_vm14 = vmand %vm148_vm9, %vm169_vm10  ;;  %vm1044_vm9 = vcmask 1042432   ;;  %vm162_vm10 = vcmp.ge.s32.totalorder %v140_v26, %v2580_v5  ;;  %v432_v20 = vld [vmem:[%s2596_s12 + $0x5e8] sm:$0xff]  ;;  %v431_v22 = vld [vmem:[%s2596_s12 + $0x5e0] sm:$0xff] }
  0x26   : > { %1066 = vmatprep.subr.mxu0 %v2555_v1  ;;  %2508 = vmatprep.subr.mxu1 %v2555_v1  ;;  %v274_v23 = vld [vmem:[%s2596_s12 + $0xf8] sm:$0xff]  ;;  %v436_v28 = vld [vmem:[%s2596_s12 + $0x608] sm:$0xff] }
  0x27   : > { %2326 = vmatpush1.msk.msra.mxu0 %vm192_vm2, %v2556_v13  ;;  %2527 = vmatpush1.msk.msra.mxu1 %vm192_vm2, %v2556_v13  ;;  %vm146_vm2 = vcmp.ge.s32.totalorder %v2577_v2, %v2580_v5  ;;  %v421_v2 = vld [vmem:[%s2596_s12 + $0x590] sm:$0xff]  ;;  %v263_v5 = vld [vmem:[%s2596_s12 + $0xa0] sm:$0xff]  ;;  %v434_v24 = vld [vmem:[%s2596_s12 + $0x5f8] sm:$0xff] }
  0x28   : > { %1068 = vmatprep.subr.mxu0 %v2555_v1  ;;  %2509 = vmatprep.subr.mxu1 %v2555_v1  ;;  %vm186_vm6 = vmand %vm146_vm2, %vm167_vm3 }
  0x29   : > { %2327 = vmatpush1.msk.msra.mxu0 %vm191_vm5, %v2556_v13  ;;  %2528 = vmatpush1.msk.msra.mxu1 %vm191_vm5, %v2556_v13  ;;  %vm204_vm5 = vmand %vm164_vm15, %vm185_vm0 }
  0x2a   : > { %1070 = vmatprep.subr.mxu0 %v2555_v1  ;;  %2510 = vmatprep.subr.mxu1 %v2555_v1  ;;  %v2316_v27 = vsel %vm204_vm5, 1.0, %v2555_v1 }
  0x2b   : > { %2328 = vmatpush1.msk.msra.mxu0 %vm190_vm8, %v2556_v13  ;;  %2529 = vmatpush1.msk.msra.mxu1 %vm190_vm8, %v2556_v13  ;;  %vm184_vm8 = vcmp.lt.s32.totalorder %v141_v25, %v2587_v9  ;;  %v273_v25 = vld [vmem:[%s2596_s12 + $0xf0] sm:$0xff] }
  0x2c   : > { %1072 = vmatprep.subr.mxu0 %v2555_v1  ;;  %2511 = vmatprep.subr.mxu1 %v2555_v1  ;;  %vm203_vm12 = vmand %vm163_vm7, %vm184_vm8 }
  0x2d   : > { %2329 = vmatpush1.msk.msra.mxu0 %vm189_vm11, %v2556_v13  ;;  %2530 = vmatpush1.msk.msra.mxu1 %vm189_vm11, %v2556_v13  ;;  %vm183_vm11 = vcmp.lt.s32.totalorder %v140_v26, %v2587_v9  ;;  %v265_v9 = vld [vmem:[%s2596_s12 + $0xb0] sm:$0xff] }
  0x2e   : > { %1074 = vmatprep.subr.mxu0 %v2555_v1  ;;  %2512 = vmatprep.subr.mxu1 %v2555_v1  ;;  %vm202_vm13 = vmand %vm162_vm10, %vm183_vm11  ;;  %v433_v26 = vld [vmem:[%s2596_s12 + $0x5f0] sm:$0xff] }
  0x2f   : > { %2330 = vmatpush1.msk.msra.mxu0 %vm188_vm14, %v2556_v13  ;;  %2531 = vmatpush1.msk.msra.mxu1 %vm188_vm14, %v2556_v13  ;;  %vm2073_vm14 = vcmask 56320  }
  0x30   : > { %1076 = vmatprep.subr.mxu0 %v2555_v1  ;;  %2513 = vmatprep.subr.mxu1 %v2555_v1 }
  0x31   : > { %2331 = vmatpush1.msk.msra.mxu0 %vm187_vm4, %v2556_v13  ;;  %2532 = vmatpush1.msk.msra.mxu1 %vm187_vm4, %v2556_v13 }
  0x32   : > { %1078 = vmatprep.subr.mxu0 %v2555_v1  ;;  %2514 = vmatprep.subr.mxu1 %v2555_v1 }
  0x33   : > { %2332 = vmatpush1.msk.msra.mxu0 %vm186_vm6, %v2556_v13  ;;  %2533 = vmatpush1.msk.msra.mxu1 %vm186_vm6, %v2556_v13 }
  0x34   : > { %1106 = vmatprep.subr.mxu0 %v2555_v1  ;;  %2515 = vmatprep.subr.mxu1 %v2555_v1 }
  0x35   : > { %2333 = vmatpush2.msk.msra.mxu0 %vm1044_vm9, %v2316_v27  ;;  %2534 = vmatpush2.msk.msra.mxu1 %vm1044_vm9, %v2316_v27  ;;  %v276_v27 = vld [vmem:[%s2596_s12 + $0x108] sm:$0xff] }
  0x36   : > { %1108 = vmatprep.subr.mxu0 %v2555_v1  ;;  %2516 = vmatprep.subr.mxu1 %v2555_v1 }
  0x37   : > { %2334 = vmatpush2.msk.msra.mxu0 %vm203_vm12, %v2556_v13  ;;  %2535 = vmatpush2.msk.msra.mxu1 %vm203_vm12, %v2556_v13 }
  0x38   : > { %1110 = vmatprep.subr.mxu0 %v2555_v1  ;;  %2517 = vmatprep.subr.mxu1 %v2555_v1  ;;  %v261_v1 = vld [vmem:[%s2596_s12 + $0x90] sm:$0xff] }
  0x39   : > { %2335 = vmatpush2.msk.msra.mxu0 %vm202_vm13, %v2556_v13  ;;  %2536 = vmatpush2.msk.msra.mxu1 %vm202_vm13, %v2556_v13  ;;  %v267_v13 = vld [vmem:[%s2596_s12 + $0xc0] sm:$0xff] }
  0x3a   : > { %1113 = vmatmul.mubr.f32.vlgmr.msra.gmra.mxu0 %v243_v29  ;;  %1513 = vmatmul.mubr.f32.vlgmr.msra.gmra.mxu1 %v403_v30  ;;  %v275_v29 = vld [vmem:[%s2596_s12 + $0x100] sm:$0xff] }
  0x3b   : > { %2337 = vmatprep.mubr.msk.f32.mxu0 %vm563_vm1, %v246_v31  ;;  %2417 = vmatprep.mubr.msk.f32.mxu1 %vm563_vm1, %v406_v32  ;;  %v435_v30 = vld [vmem:[%s2596_s12 + $0x600] sm:$0xff]  ;;  %v278_v31 = vld [vmem:[%s2596_s12 + $0x118] sm:$0xff] }
  0x3c   : > { %v438_v32 = vld [vmem:[%s2596_s12 + $0x618] sm:$0xff] }
  0x3e   : > { %1118 = vmatmul.mubr.f32.gmra.mxu0 %v245_v33  ;;  %1518 = vmatmul.mubr.f32.gmra.mxu1 %v405_v34  ;;  %v277_v33 = vld [vmem:[%s2596_s12 + $0x110] sm:$0xff] }
  0x3f   : > { %2338 = vmatprep.mubr.msk.f32.mxu0 %vm563_vm1, %v248_v35  ;;  %2418 = vmatprep.mubr.msk.f32.mxu1 %vm563_vm1, %v408_v36  ;;  %v437_v34 = vld [vmem:[%s2596_s12 + $0x610] sm:$0xff]  ;;  %v280_v35 = vld [vmem:[%s2596_s12 + $0x128] sm:$0xff] }
  0x40   : > { %v440_v36 = vld [vmem:[%s2596_s12 + $0x628] sm:$0xff] }
  0x42   : > { %1123 = vmatmul.mubr.f32.gmra.mxu0 %v247_v37  ;;  %1523 = vmatmul.mubr.f32.gmra.mxu1 %v407_v38  ;;  %v279_v37 = vld [vmem:[%s2596_s12 + $0x120] sm:$0xff] }
  0x43   : > { %2339 = vmatprep.mubr.msk.f32.mxu0 %vm563_vm1, %v250_v39  ;;  %2419 = vmatprep.mubr.msk.f32.mxu1 %vm563_vm1, %v410_v40  ;;  %v439_v38 = vld [vmem:[%s2596_s12 + $0x620] sm:$0xff]  ;;  %v282_v39 = vld [vmem:[%s2596_s12 + $0x138] sm:$0xff] }
  0x44   : > { %v442_v40 = vld [vmem:[%s2596_s12 + $0x638] sm:$0xff] }
  0x46   : > { %1128 = vmatmul.mubr.f32.gmra.mxu0 %v249_v41  ;;  %1528 = vmatmul.mubr.f32.gmra.mxu1 %v409_v42  ;;  %v281_v41 = vld [vmem:[%s2596_s12 + $0x130] sm:$0xff] }
  0x47   : > { %2340 = vmatprep.mubr.msk.f32.mxu0 %vm563_vm1, %v252_v43  ;;  %2420 = vmatprep.mubr.msk.f32.mxu1 %vm563_vm1, %v412_v44  ;;  %v441_v42 = vld [vmem:[%s2596_s12 + $0x630] sm:$0xff]  ;;  %v284_v43 = vld [vmem:[%s2596_s12 + $0x148] sm:$0xff] }
  0x48   : > { %v444_v44 = vld [vmem:[%s2596_s12 + $0x648] sm:$0xff] }
  0x4a   : > { %1133 = vmatmul.mubr.f32.gmra.mxu0 %v251_v45  ;;  %1533 = vmatmul.mubr.f32.gmra.mxu1 %v411_v46  ;;  %v283_v45 = vld [vmem:[%s2596_s12 + $0x140] sm:$0xff] }
  0x4b   : > { %2341 = vmatprep.mubr.msk.f32.mxu0 %vm563_vm1, %v254_v47  ;;  %2421 = vmatprep.mubr.msk.f32.mxu1 %vm563_vm1, %v414_v48  ;;  %v443_v46 = vld [vmem:[%s2596_s12 + $0x640] sm:$0xff]  ;;  %v286_v47 = vld [vmem:[%s2596_s12 + $0x158] sm:$0xff] }
  0x4c   : > { %v446_v48 = vld [vmem:[%s2596_s12 + $0x658] sm:$0xff] }
  0x4e   : > { %1138 = vmatmul.mubr.f32.gmra.mxu0 %v253_v49  ;;  %1538 = vmatmul.mubr.f32.gmra.mxu1 %v413_v50  ;;  %v285_v49 = vld [vmem:[%s2596_s12 + $0x150] sm:$0xff] }
  0x4f   : > { %2342 = vmatprep.mubr.msk.f32.mxu0 %vm563_vm1, %v256_v51  ;;  %2422 = vmatprep.mubr.msk.f32.mxu1 %vm563_vm1, %v416_v52  ;;  %v445_v50 = vld [vmem:[%s2596_s12 + $0x650] sm:$0xff]  ;;  %v288_v51 = vld [vmem:[%s2596_s12 + $0x168] sm:$0xff] }
  0x50   : > { %v448_v52 = vld [vmem:[%s2596_s12 + $0x668] sm:$0xff] }
  0x52   : > { %1143 = vmatmul.mubr.f32.gmra.mxu0 %v255_v53  ;;  %1543 = vmatmul.mubr.f32.gmra.mxu1 %v415_v54  ;;  %v287_v53 = vld [vmem:[%s2596_s12 + $0x160] sm:$0xff] }
  0x53   : > { %2343 = vmatprep.mubr.msk.f32.mxu0 %vm563_vm1, %v258_v55  ;;  %2423 = vmatprep.mubr.msk.f32.mxu1 %vm563_vm1, %v418_v56  ;;  %v447_v54 = vld [vmem:[%s2596_s12 + $0x660] sm:$0xff]  ;;  %v290_v55 = vld [vmem:[%s2596_s12 + $0x178] sm:$0xff] }
  0x54   : > { %v450_v56 = vld [vmem:[%s2596_s12 + $0x678] sm:$0xff] }
  0x56   : > { %1148 = vmatmul.mubr.f32.gmra.mxu0 %v257_v57  ;;  %1548 = vmatmul.mubr.f32.gmra.mxu1 %v417_v58  ;;  %v289_v57 = vld [vmem:[%s2596_s12 + $0x170] sm:$0xff] }
  0x57   : > { %2344 = vmatprep.mubr.msk.f32.mxu0 %vm563_vm1, %v260_v59  ;;  %2424 = vmatprep.mubr.msk.f32.mxu1 %vm563_vm1, %v420_v60  ;;  %v449_v58 = vld [vmem:[%s2596_s12 + $0x670] sm:$0xff]  ;;  %v292_v59 = vld [vmem:[%s2596_s12 + $0x188] sm:$0xff] }
  0x58   : > { %v452_v60 = vld [vmem:[%s2596_s12 + $0x688] sm:$0xff] }
  0x5a   : > { %1153 = vmatmul.mubr.f32.gmra.mxu0 %v259_v61  ;;  %1553 = vmatmul.mubr.f32.gmra.mxu1 %v419_v62  ;;  %v291_v61 = vld [vmem:[%s2596_s12 + $0x180] sm:$0xff] }
  0x5b   : > { %2345 = vmatprep.mubr.msk.f32.mxu0 %vm563_vm1, %v262_v63  ;;  %2425 = vmatprep.mubr.msk.f32.mxu1 %vm563_vm1, %v422_v0  ;;  %v451_v62 = vld [vmem:[%s2596_s12 + $0x680] sm:$0xff]  ;;  %v294_v63 = vld [vmem:[%s2596_s12 + $0x198] sm:$0xff] }
  0x5c   : > { %v454_v0 = vld [vmem:[%s2596_s12 + $0x698] sm:$0xff] }
  0x5e   : > { %1158 = vmatmul.mubr.f32.gmra.mxu0 %v261_v1  ;;  %1558 = vmatmul.mubr.f32.gmra.mxu1 %v421_v2  ;;  %v293_v1 = vld [vmem:[%s2596_s12 + $0x190] sm:$0xff] }
  0x5f   : > { %2346 = vmatprep.mubr.msk.f32.mxu0 %vm563_vm1, %v264_v3  ;;  %2426 = vmatprep.mubr.msk.f32.mxu1 %vm563_vm1, %v424_v4  ;;  %v453_v2 = vld [vmem:[%s2596_s12 + $0x690] sm:$0xff]  ;;  %v296_v3 = vld [vmem:[%s2596_s12 + $0x1a8] sm:$0xff] }
  0x60   : > { %v456_v4 = vld [vmem:[%s2596_s12 + $0x6a8] sm:$0xff] }
  0x62   : > { %1163 = vmatmul.mubr.f32.gmra.mxu0 %v263_v5  ;;  %1563 = vmatmul.mubr.f32.gmra.mxu1 %v423_v6  ;;  %v295_v5 = vld [vmem:[%s2596_s12 + $0x1a0] sm:$0xff] }
  0x63   : > { %2347 = vmatprep.mubr.msk.f32.mxu0 %vm563_vm1, %v266_v7  ;;  %2427 = vmatprep.mubr.msk.f32.mxu1 %vm563_vm1, %v426_v8  ;;  %v455_v6 = vld [vmem:[%s2596_s12 + $0x6a0] sm:$0xff]  ;;  %v298_v7 = vld [vmem:[%s2596_s12 + $0x1b8] sm:$0xff] }
  0x64   : > { %v458_v8 = vld [vmem:[%s2596_s12 + $0x6b8] sm:$0xff] }
  0x66   : > { %1168 = vmatmul.mubr.f32.gmra.mxu0 %v265_v9  ;;  %1568 = vmatmul.mubr.f32.gmra.mxu1 %v425_v10  ;;  %v297_v9 = vld [vmem:[%s2596_s12 + $0x1b0] sm:$0xff] }
  0x67   : > { %2348 = vmatprep.mubr.msk.f32.mxu0 %vm563_vm1, %v268_v11  ;;  %2428 = vmatprep.mubr.msk.f32.mxu1 %vm563_vm1, %v428_v12  ;;  %v457_v10 = vld [vmem:[%s2596_s12 + $0x6b0] sm:$0xff]  ;;  %v300_v11 = vld [vmem:[%s2596_s12 + $0x1c8] sm:$0xff] }
  0x68   : > { %v460_v12 = vld [vmem:[%s2596_s12 + $0x6c8] sm:$0xff] }
  0x6a   : > { %1173 = vmatmul.mubr.f32.gmra.mxu0 %v267_v13  ;;  %1573 = vmatmul.mubr.f32.gmra.mxu1 %v427_v14  ;;  %v299_v13 = vld [vmem:[%s2596_s12 + $0x1c0] sm:$0xff] }
  0x6b   : > { %2349 = vmatprep.mubr.msk.f32.mxu0 %vm563_vm1, %v270_v15  ;;  %2429 = vmatprep.mubr.msk.f32.mxu1 %vm563_vm1, %v430_v16  ;;  %v459_v14 = vld [vmem:[%s2596_s12 + $0x6c0] sm:$0xff]  ;;  %v302_v15 = vld [vmem:[%s2596_s12 + $0x1d8] sm:$0xff] }
  0x6c   : > { %v462_v16 = vld [vmem:[%s2596_s12 + $0x6d8] sm:$0xff] }
  0x6e   : > { %1178 = vmatmul.mubr.f32.gmra.mxu0 %v269_v17  ;;  %1578 = vmatmul.mubr.f32.gmra.mxu1 %v429_v18  ;;  %v301_v17 = vld [vmem:[%s2596_s12 + $0x1d0] sm:$0xff] }
  0x6f   : > { %2350 = vmatprep.mubr.msk.f32.mxu0 %vm563_vm1, %v272_v19  ;;  %2430 = vmatprep.mubr.msk.f32.mxu1 %vm563_vm1, %v432_v20  ;;  %v461_v18 = vld [vmem:[%s2596_s12 + $0x6d0] sm:$0xff]  ;;  %v304_v19 = vld [vmem:[%s2596_s12 + $0x1e8] sm:$0xff] }
  0x70   : > { %v464_v20 = vld [vmem:[%s2596_s12 + $0x6e8] sm:$0xff] }
  0x72   : > { %1183 = vmatmul.mubr.f32.gmra.mxu0 %v271_v21  ;;  %1583 = vmatmul.mubr.f32.gmra.mxu1 %v431_v22  ;;  %v303_v21 = vld [vmem:[%s2596_s12 + $0x1e0] sm:$0xff] }
  0x73   : > { %2351 = vmatprep.mubr.msk.f32.mxu0 %vm563_vm1, %v274_v23  ;;  %2431 = vmatprep.mubr.msk.f32.mxu1 %vm563_vm1, %v434_v24  ;;  %v463_v22 = vld [vmem:[%s2596_s12 + $0x6e0] sm:$0xff]  ;;  %v306_v23 = vld [vmem:[%s2596_s12 + $0x1f8] sm:$0xff] }
  0x74   : > { %v466_v24 = vld [vmem:[%s2596_s12 + $0x6f8] sm:$0xff] }
  0x76   : > { %1188 = vmatmul.mubr.f32.gmra.mxu0 %v273_v25  ;;  %1588 = vmatmul.mubr.f32.gmra.mxu1 %v433_v26  ;;  %v305_v25 = vld [vmem:[%s2596_s12 + $0x1f0] sm:$0xff] }
  0x77   : > { %2352 = vmatprep.mubr.msk.f32.mxu0 %vm563_vm1, %v276_v27  ;;  %2432 = vmatprep.mubr.msk.f32.mxu1 %vm563_vm1, %v436_v28  ;;  %v465_v26 = vld [vmem:[%s2596_s12 + $0x6f0] sm:$0xff]  ;;  %v308_v27 = vld [vmem:[%s2596_s12 + $0x208] sm:$0xff] }
  0x78   : > { %v468_v28 = vld [vmem:[%s2596_s12 + $0x708] sm:$0xff] }
  0x7a   : > { %1193 = vmatmul.mubr.f32.gmra.mxu0 %v275_v29  ;;  %1593 = vmatmul.mubr.f32.gmra.mxu1 %v435_v30  ;;  %v307_v29 = vld [vmem:[%s2596_s12 + $0x200] sm:$0xff] }
  0x7b   : > { %2353 = vmatprep.mubr.msk.f32.mxu0 %vm563_vm1, %v278_v31  ;;  %2433 = vmatprep.mubr.msk.f32.mxu1 %vm563_vm1, %v438_v32  ;;  %v467_v30 = vld [vmem:[%s2596_s12 + $0x700] sm:$0xff]  ;;  %v310_v31 = vld [vmem:[%s2596_s12 + $0x218] sm:$0xff] }
  0x7c   : > { %v470_v32 = vld [vmem:[%s2596_s12 + $0x718] sm:$0xff] }
  0x7e   : > { %1198 = vmatmul.mubr.f32.gmra.mxu0 %v277_v33  ;;  %1598 = vmatmul.mubr.f32.gmra.mxu1 %v437_v34  ;;  %v309_v33 = vld [vmem:[%s2596_s12 + $0x210] sm:$0xff] }
  0x7f   : > { %2354 = vmatprep.mubr.msk.f32.mxu0 %vm563_vm1, %v280_v35  ;;  %2434 = vmatprep.mubr.msk.f32.mxu1 %vm563_vm1, %v440_v36  ;;  %v469_v34 = vld [vmem:[%s2596_s12 + $0x710] sm:$0xff]  ;;  %v312_v35 = vld [vmem:[%s2596_s12 + $0x228] sm:$0xff] }
  0x80   : > { %v472_v36 = vld [vmem:[%s2596_s12 + $0x728] sm:$0xff] }
  0x82   : > { %1203 = vmatmul.mubr.f32.gmra.mxu0 %v279_v37  ;;  %1603 = vmatmul.mubr.f32.gmra.mxu1 %v439_v38  ;;  %v311_v37 = vld [vmem:[%s2596_s12 + $0x220] sm:$0xff] }
  0x83   : > { %2355 = vmatprep.mubr.msk.f32.mxu0 %vm563_vm1, %v282_v39  ;;  %2435 = vmatprep.mubr.msk.f32.mxu1 %vm563_vm1, %v442_v40  ;;  %v471_v38 = vld [vmem:[%s2596_s12 + $0x720] sm:$0xff]  ;;  %v314_v39 = vld [vmem:[%s2596_s12 + $0x238] sm:$0xff] }
  0x84   : > { %v474_v40 = vld [vmem:[%s2596_s12 + $0x738] sm:$0xff] }
  0x86   : > { %1208 = vmatmul.mubr.f32.gmra.mxu0 %v281_v41  ;;  %1608 = vmatmul.mubr.f32.gmra.mxu1 %v441_v42  ;;  %v313_v41 = vld [vmem:[%s2596_s12 + $0x230] sm:$0xff] }
  0x87   : > { %2356 = vmatprep.mubr.msk.f32.mxu0 %vm563_vm1, %v284_v43  ;;  %2436 = vmatprep.mubr.msk.f32.mxu1 %vm563_vm1, %v444_v44  ;;  %v473_v42 = vld [vmem:[%s2596_s12 + $0x730] sm:$0xff]  ;;  %v316_v43 = vld [vmem:[%s2596_s12 + $0x248] sm:$0xff] }
  0x88   : > { %v476_v44 = vld [vmem:[%s2596_s12 + $0x748] sm:$0xff] }
  0x8a   : > { %1213 = vmatmul.mubr.f32.gmra.mxu0 %v283_v45  ;;  %1613 = vmatmul.mubr.f32.gmra.mxu1 %v443_v46  ;;  %v315_v45 = vld [vmem:[%s2596_s12 + $0x240] sm:$0xff] }
  0x8b   : > { %2357 = vmatprep.mubr.msk.f32.mxu0 %vm563_vm1, %v286_v47  ;;  %2437 = vmatprep.mubr.msk.f32.mxu1 %vm563_vm1, %v446_v48  ;;  %v475_v46 = vld [vmem:[%s2596_s12 + $0x740] sm:$0xff]  ;;  %v318_v47 = vld [vmem:[%s2596_s12 + $0x258] sm:$0xff] }
  0x8c   : > { %v478_v48 = vld [vmem:[%s2596_s12 + $0x758] sm:$0xff] }
  0x8e   : > { %1218 = vmatmul.mubr.f32.gmra.mxu0 %v285_v49  ;;  %1618 = vmatmul.mubr.f32.gmra.mxu1 %v445_v50  ;;  %v317_v49 = vld [vmem:[%s2596_s12 + $0x250] sm:$0xff] }
  0x8f   : > { %2358 = vmatprep.mubr.msk.f32.mxu0 %vm563_vm1, %v288_v51  ;;  %2438 = vmatprep.mubr.msk.f32.mxu1 %vm563_vm1, %v448_v52  ;;  %v477_v50 = vld [vmem:[%s2596_s12 + $0x750] sm:$0xff]  ;;  %v320_v51 = vld [vmem:[%s2596_s12 + $0x268] sm:$0xff] }
  0x90   : > { %v480_v52 = vld [vmem:[%s2596_s12 + $0x768] sm:$0xff] }
  0x92   : > { %1223 = vmatmul.mubr.f32.gmra.mxu0 %v287_v53  ;;  %1623 = vmatmul.mubr.f32.gmra.mxu1 %v447_v54  ;;  %v319_v53 = vld [vmem:[%s2596_s12 + $0x260] sm:$0xff] }
  0x93   : > { %2359 = vmatprep.mubr.msk.f32.mxu0 %vm563_vm1, %v290_v55  ;;  %2439 = vmatprep.mubr.msk.f32.mxu1 %vm563_vm1, %v450_v56  ;;  %v479_v54 = vld [vmem:[%s2596_s12 + $0x760] sm:$0xff]  ;;  %v322_v55 = vld [vmem:[%s2596_s12 + $0x278] sm:$0xff] }
  0x94   : > { %v482_v56 = vld [vmem:[%s2596_s12 + $0x778] sm:$0xff] }
  0x96   : > { %1228 = vmatmul.mubr.f32.gmra.mxu0 %v289_v57  ;;  %1628 = vmatmul.mubr.f32.gmra.mxu1 %v449_v58  ;;  %v321_v57 = vld [vmem:[%s2596_s12 + $0x270] sm:$0xff] }
  0x97   : > { %2360 = vmatprep.mubr.msk.f32.mxu0 %vm563_vm1, %v292_v59  ;;  %2440 = vmatprep.mubr.msk.f32.mxu1 %vm563_vm1, %v452_v60  ;;  %v481_v58 = vld [vmem:[%s2596_s12 + $0x770] sm:$0xff]  ;;  %v324_v59 = vld [vmem:[%s2596_s12 + $0x288] sm:$0xff] }
  0x98   : > { %v484_v60 = vld [vmem:[%s2596_s12 + $0x788] sm:$0xff] }
  0x9a   : > { %1233 = vmatmul.mubr.f32.gmra.mxu0 %v291_v61  ;;  %1633 = vmatmul.mubr.f32.gmra.mxu1 %v451_v62  ;;  %v323_v61 = vld [vmem:[%s2596_s12 + $0x280] sm:$0xff] }
  0x9b   : > { %2361 = vmatprep.mubr.msk.f32.mxu0 %vm563_vm1, %v294_v63  ;;  %2441 = vmatprep.mubr.msk.f32.mxu1 %vm563_vm1, %v454_v0  ;;  %v483_v62 = vld [vmem:[%s2596_s12 + $0x780] sm:$0xff]  ;;  %v326_v63 = vld [vmem:[%s2596_s12 + $0x298] sm:$0xff] }
  0x9c   : > { %v486_v0 = vld [vmem:[%s2596_s12 + $0x798] sm:$0xff] }
  0x9e   : > { %1238 = vmatmul.mubr.f32.gmra.mxu0 %v293_v1  ;;  %1638 = vmatmul.mubr.f32.gmra.mxu1 %v453_v2  ;;  %v325_v1 = vld [vmem:[%s2596_s12 + $0x290] sm:$0xff] }
  0x9f   : > { %2362 = vmatprep.mubr.msk.f32.mxu0 %vm563_vm1, %v296_v3  ;;  %2442 = vmatprep.mubr.msk.f32.mxu1 %vm563_vm1, %v456_v4  ;;  %v485_v2 = vld [vmem:[%s2596_s12 + $0x790] sm:$0xff]  ;;  %v328_v3 = vld [vmem:[%s2596_s12 + $0x2a8] sm:$0xff] }
  0xa0   : > { %v488_v4 = vld [vmem:[%s2596_s12 + $0x7a8] sm:$0xff] }
  0xa2   : > { %1243 = vmatmul.mubr.f32.gmra.mxu0 %v295_v5  ;;  %1643 = vmatmul.mubr.f32.gmra.mxu1 %v455_v6  ;;  %v327_v5 = vld [vmem:[%s2596_s12 + $0x2a0] sm:$0xff] }
  0xa3   : > { %2363 = vmatprep.mubr.msk.f32.mxu0 %vm563_vm1, %v298_v7  ;;  %2443 = vmatprep.mubr.msk.f32.mxu1 %vm563_vm1, %v458_v8  ;;  %v487_v6 = vld [vmem:[%s2596_s12 + $0x7a0] sm:$0xff]  ;;  %v330_v7 = vld [vmem:[%s2596_s12 + $0x2b8] sm:$0xff] }
  0xa4   : > { %v490_v8 = vld [vmem:[%s2596_s12 + $0x7b8] sm:$0xff] }
  0xa6   : > { %1248 = vmatmul.mubr.f32.gmra.mxu0 %v297_v9  ;;  %1648 = vmatmul.mubr.f32.gmra.mxu1 %v457_v10  ;;  %v329_v9 = vld [vmem:[%s2596_s12 + $0x2b0] sm:$0xff] }
  0xa7   : > { %2364 = vmatprep.mubr.msk.f32.mxu0 %vm563_vm1, %v300_v11  ;;  %2444 = vmatprep.mubr.msk.f32.mxu1 %vm563_vm1, %v460_v12  ;;  %v489_v10 = vld [vmem:[%s2596_s12 + $0x7b0] sm:$0xff]  ;;  %v332_v11 = vld [vmem:[%s2596_s12 + $0x2c8] sm:$0xff] }
  0xa8   : > { %v492_v12 = vld [vmem:[%s2596_s12 + $0x7c8] sm:$0xff] }
  0xaa   : > { %1253 = vmatmul.mubr.f32.gmra.mxu0 %v299_v13  ;;  %1653 = vmatmul.mubr.f32.gmra.mxu1 %v459_v14  ;;  %v331_v13 = vld [vmem:[%s2596_s12 + $0x2c0] sm:$0xff] }
  0xab   : > { %2365 = vmatprep.mubr.msk.f32.mxu0 %vm563_vm1, %v302_v15  ;;  %2445 = vmatprep.mubr.msk.f32.mxu1 %vm563_vm1, %v462_v16  ;;  %v491_v14 = vld [vmem:[%s2596_s12 + $0x7c0] sm:$0xff]  ;;  %v334_v15 = vld [vmem:[%s2596_s12 + $0x2d8] sm:$0xff] }
  0xac   : > { %v494_v16 = vld [vmem:[%s2596_s12 + $0x7d8] sm:$0xff] }
  0xae   : > { %1258 = vmatmul.mubr.f32.gmra.mxu0 %v301_v17  ;;  %1658 = vmatmul.mubr.f32.gmra.mxu1 %v461_v18  ;;  %v333_v17 = vld [vmem:[%s2596_s12 + $0x2d0] sm:$0xff] }
  0xaf   : > { %2366 = vmatprep.mubr.msk.f32.mxu0 %vm563_vm1, %v304_v19  ;;  %2446 = vmatprep.mubr.msk.f32.mxu1 %vm563_vm1, %v464_v20  ;;  %v493_v18 = vld [vmem:[%s2596_s12 + $0x7d0] sm:$0xff]  ;;  %v336_v19 = vld [vmem:[%s2596_s12 + $0x2e8] sm:$0xff] }
  0xb0   : > { %v496_v20 = vld [vmem:[%s2596_s12 + $0x7e8] sm:$0xff] }
  0xb2   : > { %1263 = vmatmul.mubr.f32.gmra.mxu0 %v303_v21  ;;  %1663 = vmatmul.mubr.f32.gmra.mxu1 %v463_v22  ;;  %v335_v21 = vld [vmem:[%s2596_s12 + $0x2e0] sm:$0xff] }
  0xb3   : > { %2367 = vmatprep.mubr.msk.f32.mxu0 %vm563_vm1, %v306_v23  ;;  %2447 = vmatprep.mubr.msk.f32.mxu1 %vm563_vm1, %v466_v24  ;;  %v495_v22 = vld [vmem:[%s2596_s12 + $0x7e0] sm:$0xff]  ;;  %v338_v23 = vld [vmem:[%s2596_s12 + $0x2f8] sm:$0xff] }
  0xb4   : > { %v498_v24 = vld [vmem:[%s2596_s12 + $0x7f8] sm:$0xff] }
  0xb6   : > { %1268 = vmatmul.mubr.f32.gmra.mxu0 %v305_v25  ;;  %1668 = vmatmul.mubr.f32.gmra.mxu1 %v465_v26  ;;  %v337_v25 = vld [vmem:[%s2596_s12 + $0x2f0] sm:$0xff] }
  0xb7   : > { %2368 = vmatprep.mubr.msk.f32.mxu0 %vm563_vm1, %v308_v27  ;;  %2448 = vmatprep.mubr.msk.f32.mxu1 %vm563_vm1, %v468_v28  ;;  %v497_v26 = vld [vmem:[%s2596_s12 + $0x7f0] sm:$0xff]  ;;  %v340_v27 = vld [vmem:[%s2596_s12 + $0x308] sm:$0xff] }
  0xb8   : > { %v500_v28 = vld [vmem:[%s2596_s12 + $0x808] sm:$0xff] }
  0xba   : > { %1273 = vmatmul.mubr.f32.gmra.mxu0 %v307_v29  ;;  %1673 = vmatmul.mubr.f32.gmra.mxu1 %v467_v30  ;;  %v339_v29 = vld [vmem:[%s2596_s12 + $0x300] sm:$0xff] }
  0xbb   : > { %2369 = vmatprep.mubr.msk.f32.mxu0 %vm563_vm1, %v310_v31  ;;  %2449 = vmatprep.mubr.msk.f32.mxu1 %vm563_vm1, %v470_v32  ;;  %v499_v30 = vld [vmem:[%s2596_s12 + $0x800] sm:$0xff]  ;;  %v342_v31 = vld [vmem:[%s2596_s12 + $0x318] sm:$0xff] }
  0xbc   : > { %v502_v32 = vld [vmem:[%s2596_s12 + $0x818] sm:$0xff] }
  0xbe   : > { %1278 = vmatmul.mubr.f32.gmra.mxu0 %v309_v33  ;;  %1678 = vmatmul.mubr.f32.gmra.mxu1 %v469_v34 }
  0xbf   : > { %2370 = vmatprep.mubr.msk.f32.mxu0 %vm563_vm1, %v312_v35  ;;  %2450 = vmatprep.mubr.msk.f32.mxu1 %vm563_vm1, %v472_v36  ;;  %v341_v36 = vld [vmem:[%s2596_s12 + $0x310] sm:$0xff] }
  0xc2   : > { %1283 = vmatmul.mubr.f32.gmra.mxu0 %v311_v37  ;;  %1683 = vmatmul.mubr.f32.gmra.mxu1 %v471_v38 }
  0xc3   : > { %2371 = vmatprep.mubr.msk.f32.mxu0 %vm563_vm1, %v314_v39  ;;  %2451 = vmatprep.mubr.msk.f32.mxu1 %vm563_vm1, %v474_v40  ;;  %v501_v39 = vld [vmem:[%s2596_s12 + $0x810] sm:$0xff]  ;;  %v344_v40 = vld [vmem:[%s2596_s12 + $0x328] sm:$0xff] }
  0xc6   : > { %1288 = vmatmul.mubr.f32.gmra.mxu0 %v313_v41  ;;  %1688 = vmatmul.mubr.f32.gmra.mxu1 %v473_v42  ;;  %v504_v42 = vld [vmem:[%s2596_s12 + $0x828] sm:$0xff] }
  0xc7   : > { %2372 = vmatprep.mubr.msk.f32.mxu0 %vm563_vm1, %v316_v43  ;;  %2452 = vmatprep.mubr.msk.f32.mxu1 %vm563_vm1, %v476_v44 }
  0xca   : > { %1293 = vmatmul.mubr.f32.gmra.mxu0 %v315_v45  ;;  %1693 = vmatmul.mubr.f32.gmra.mxu1 %v475_v46  ;;  %v343_v46 = vld [vmem:[%s2596_s12 + $0x320] sm:$0xff] }
  0xcb   : > { %2373 = vmatprep.mubr.msk.f32.mxu0 %vm563_vm1, %v318_v47  ;;  %2453 = vmatprep.mubr.msk.f32.mxu1 %vm563_vm1, %v478_v48 }
  0xce   : > { %1298 = vmatmul.mubr.f32.gmra.mxu0 %v317_v49  ;;  %1698 = vmatmul.mubr.f32.gmra.mxu1 %v477_v50  ;;  %v503_v49 = vld [vmem:[%s2596_s12 + $0x820] sm:$0xff]  ;;  %v346_v50 = vld [vmem:[%s2596_s12 + $0x338] sm:$0xff] }
  0xcf   : > { %2374 = vmatprep.mubr.msk.f32.mxu0 %vm563_vm1, %v320_v51  ;;  %2454 = vmatprep.mubr.msk.f32.mxu1 %vm563_vm1, %v480_v52  ;;  %v506_v52 = vld [vmem:[%s2596_s12 + $0x838] sm:$0xff] }
  0xd2   : > { %1303 = vmatmul.mubr.f32.gmra.mxu0 %v319_v53  ;;  %1703 = vmatmul.mubr.f32.gmra.mxu1 %v479_v54 }
  0xd3   : > { %2375 = vmatprep.mubr.msk.f32.mxu0 %vm563_vm1, %v322_v55  ;;  %2455 = vmatprep.mubr.msk.f32.mxu1 %vm563_vm1, %v482_v56  ;;  %v345_v56 = vld [vmem:[%s2596_s12 + $0x330] sm:$0xff] }
  0xd6   : > { %1308 = vmatmul.mubr.f32.gmra.mxu0 %v321_v57  ;;  %1708 = vmatmul.mubr.f32.gmra.mxu1 %v481_v58 }
  0xd7   : > { %2376 = vmatprep.mubr.msk.f32.mxu0 %vm563_vm1, %v324_v59  ;;  %2456 = vmatprep.mubr.msk.f32.mxu1 %vm563_vm1, %v484_v60  ;;  %v505_v59 = vld [vmem:[%s2596_s12 + $0x830] sm:$0xff]  ;;  %v348_v60 = vld [vmem:[%s2596_s12 + $0x348] sm:$0xff] }
  0xda   : > { %1313 = vmatmul.mubr.f32.gmra.mxu0 %v323_v61  ;;  %1713 = vmatmul.mubr.f32.gmra.mxu1 %v483_v62  ;;  %v508_v62 = vld [vmem:[%s2596_s12 + $0x848] sm:$0xff] }
  0xdb   : > { %2377 = vmatprep.mubr.msk.f32.mxu0 %vm563_vm1, %v326_v63  ;;  %2457 = vmatprep.mubr.msk.f32.mxu1 %vm563_vm1, %v486_v0 }
  0xde   : > { %1318 = vmatmul.mubr.f32.gmra.mxu0 %v325_v1  ;;  %1718 = vmatmul.mubr.f32.gmra.mxu1 %v485_v2  ;;  %v347_v2 = vld [vmem:[%s2596_s12 + $0x340] sm:$0xff] }
  0xdf   : > { %2378 = vmatprep.mubr.msk.f32.mxu0 %vm563_vm1, %v328_v3  ;;  %2458 = vmatprep.mubr.msk.f32.mxu1 %vm563_vm1, %v488_v4 }
  0xe2   : > { %1323 = vmatmul.mubr.f32.gmra.mxu0 %v327_v5  ;;  %1723 = vmatmul.mubr.f32.gmra.mxu1 %v487_v6  ;;  %v507_v5 = vld [vmem:[%s2596_s12 + $0x840] sm:$0xff]  ;;  %v350_v6 = vld [vmem:[%s2596_s12 + $0x358] sm:$0xff] }
  0xe3   : > { %2379 = vmatprep.mubr.msk.f32.mxu0 %vm563_vm1, %v330_v7  ;;  %2459 = vmatprep.mubr.msk.f32.mxu1 %vm563_vm1, %v490_v8  ;;  %v510_v8 = vld [vmem:[%s2596_s12 + $0x858] sm:$0xff] }
  0xe6   : > { %1328 = vmatmul.mubr.f32.gmra.mxu0 %v329_v9  ;;  %1728 = vmatmul.mubr.f32.gmra.mxu1 %v489_v10 }
  0xe7   : > { %2380 = vmatprep.mubr.msk.f32.mxu0 %vm563_vm1, %v332_v11  ;;  %2460 = vmatprep.mubr.msk.f32.mxu1 %vm563_vm1, %v492_v12  ;;  %v349_v12 = vld [vmem:[%s2596_s12 + $0x350] sm:$0xff] }
  0xea   : > { %1333 = vmatmul.mubr.f32.gmra.mxu0 %v331_v13  ;;  %1733 = vmatmul.mubr.f32.gmra.mxu1 %v491_v14 }
  0xeb   : > { %2381 = vmatprep.mubr.msk.f32.mxu0 %vm563_vm1, %v334_v15  ;;  %2461 = vmatprep.mubr.msk.f32.mxu1 %vm563_vm1, %v494_v16  ;;  %v509_v15 = vld [vmem:[%s2596_s12 + $0x850] sm:$0xff]  ;;  %v352_v16 = vld [vmem:[%s2596_s12 + $0x368] sm:$0xff] }
  0xee   : > { %1338 = vmatmul.mubr.f32.gmra.mxu0 %v333_v17  ;;  %1738 = vmatmul.mubr.f32.gmra.mxu1 %v493_v18  ;;  %v512_v18 = vld [vmem:[%s2596_s12 + $0x868] sm:$0xff] }
  0xef   : > { %2382 = vmatprep.mubr.msk.f32.mxu0 %vm563_vm1, %v336_v19  ;;  %2462 = vmatprep.mubr.msk.f32.mxu1 %vm563_vm1, %v496_v20 }
  0xf2   : > { %1343 = vmatmul.mubr.f32.gmra.mxu0 %v335_v21  ;;  %1743 = vmatmul.mubr.f32.gmra.mxu1 %v495_v22  ;;  %v351_v22 = vld [vmem:[%s2596_s12 + $0x360] sm:$0xff] }
  0xf3   : > { %2383 = vmatprep.mubr.msk.f32.mxu0 %vm563_vm1, %v338_v23  ;;  %2463 = vmatprep.mubr.msk.f32.mxu1 %vm563_vm1, %v498_v24 }
  0xf6   : > { %1348 = vmatmul.mubr.f32.gmra.mxu0 %v337_v25  ;;  %1748 = vmatmul.mubr.f32.gmra.mxu1 %v497_v26  ;;  %v511_v25 = vld [vmem:[%s2596_s12 + $0x860] sm:$0xff]  ;;  %v354_v26 = vld [vmem:[%s2596_s12 + $0x378] sm:$0xff] }
  0xf7   : > { %2384 = vmatprep.mubr.msk.f32.mxu0 %vm563_vm1, %v340_v27  ;;  %2464 = vmatprep.mubr.msk.f32.mxu1 %vm563_vm1, %v500_v28  ;;  %v514_v28 = vld [vmem:[%s2596_s12 + $0x878] sm:$0xff] }
  0xfa   : > { %v1114_v33 = vpop.f32.mrf.mxu0  ;;  %1353 = vmatmul.mubr.f32.gmra.mxu0 %v339_v29  ;;  %v1514_v35 = vpop.f32.mrf.mxu1  ;;  %1753 = vmatmul.mubr.f32.gmra.mxu1 %v499_v30 }
  0xfb   : > { %v1913_v34 = vmul.f32 0.04761905, %v1114_v33  ;;  %2385 = vmatprep.mubr.msk.f32.mxu0 %vm563_vm1, %v342_v31  ;;  %v1993_v37 = vmul.f32 0.04761905, %v1514_v35  ;;  %2465 = vmatprep.mubr.msk.f32.mxu1 %vm563_vm1, %v502_v32  ;;  %v353_v32 = vld [vmem:[%s2596_s12 + $0x370] sm:$0xff] }
  0xfc   : > { %v1116_v38 = vpop.f32.mrf.mxu0  ;;  %v1516_v41 = vpop.f32.mrf.mxu1  ;;  %v513_v35 = vld [vmem:[%s2596_s12 + $0x870] sm:$0xff] }
  0xfd   : > { %2074 = vst.msk [vmem:[%s3022_s16] sm:$0xff] %vm2073_vm14, %v1913_v34  ;;  %2154 = vst.msk [vmem:[%s3022_s16 + $0x280] sm:$0xff] %vm2073_vm14, %v1993_v37  ;;  %v516_v38 = vld [vmem:[%s2596_s12 + $0x888] sm:$0xff] }
  0xfe   : > { %v1119_v43 = vpop.f32.mrf.mxu0  ;;  %1358 = vmatmul.mubr.f32.gmra.mxu0 %v341_v36  ;;  %v1519_v45 = vpop.f32.mrf.mxu1  ;;  %1758 = vmatmul.mubr.f32.gmra.mxu1 %v501_v39  ;;  %v356_v36 = vld [vmem:[%s2596_s12 + $0x388] sm:$0xff] }
  0xff   : > { %v1914_v44 = vmul.f32 0.04761905, %v1119_v43  ;;  %2386 = vmatprep.mubr.msk.f32.mxu0 %vm563_vm1, %v344_v40  ;;  %v1994_v47 = vmul.f32 0.04761905, %v1519_v45  ;;  %2466 = vmatprep.mubr.msk.f32.mxu1 %vm563_vm1, %v504_v42  ;;  %v355_v42 = vld [vmem:[%s2596_s12 + $0x380] sm:$0xff] }
 0x100   : > { %v1121_v48 = vpop.f32.mrf.mxu0  ;;  %v1521_v51 = vpop.f32.mrf.mxu1  ;;  %v515_v45 = vld [vmem:[%s2596_s12 + $0x880] sm:$0xff] }
 0x101   : > { %2075 = vst.msk [vmem:[%s3022_s16 + $0x8] sm:$0xff] %vm2073_vm14, %v1914_v44  ;;  %2155 = vst.msk [vmem:[%s3022_s16 + $0x288] sm:$0xff] %vm2073_vm14, %v1994_v47  ;;  %v518_v48 = vld [vmem:[%s2596_s12 + $0x898] sm:$0xff] }
 0x102   : > { %v1124_v53 = vpop.f32.mrf.mxu0  ;;  %1363 = vmatmul.mubr.f32.gmra.mxu0 %v343_v46  ;;  %v1524_v55 = vpop.f32.mrf.mxu1  ;;  %1763 = vmatmul.mubr.f32.gmra.mxu1 %v503_v49  ;;  %v358_v46 = vld [vmem:[%s2596_s12 + $0x398] sm:$0xff] }
 0x103   : > { %v1915_v54 = vmul.f32 0.04761905, %v1124_v53  ;;  %2387 = vmatprep.mubr.msk.f32.mxu0 %vm563_vm1, %v346_v50  ;;  %v1995_v57 = vmul.f32 0.04761905, %v1524_v55  ;;  %2467 = vmatprep.mubr.msk.f32.mxu1 %vm563_vm1, %v506_v52  ;;  %v357_v52 = vld [vmem:[%s2596_s12 + $0x390] sm:$0xff] }
 0x104   : > { %v1126_v58 = vpop.f32.mrf.mxu0  ;;  %v1526_v61 = vpop.f32.mrf.mxu1  ;;  %v517_v55 = vld [vmem:[%s2596_s12 + $0x890] sm:$0xff] }
 0x105   : > { %2076 = vst.msk [vmem:[%s3022_s16 + $0x10] sm:$0xff] %vm2073_vm14, %v1915_v54  ;;  %2156 = vst.msk [vmem:[%s3022_s16 + $0x290] sm:$0xff] %vm2073_vm14, %v1995_v57  ;;  %v520_v58 = vld [vmem:[%s2596_s12 + $0x8a8] sm:$0xff] }
 0x106   : > { %v1129_v63 = vpop.f32.mrf.mxu0  ;;  %1368 = vmatmul.mubr.f32.gmra.mxu0 %v345_v56  ;;  %v1529_v1 = vpop.f32.mrf.mxu1  ;;  %1768 = vmatmul.mubr.f32.gmra.mxu1 %v505_v59  ;;  %v360_v56 = vld [vmem:[%s2596_s12 + $0x3a8] sm:$0xff] }
 0x107   : > { %v1916_v0 = vmul.f32 0.04761905, %v1129_v63  ;;  %2388 = vmatprep.mubr.msk.f32.mxu0 %vm563_vm1, %v348_v60  ;;  %v1996_v3 = vmul.f32 0.04761905, %v1529_v1  ;;  %2468 = vmatprep.mubr.msk.f32.mxu1 %vm563_vm1, %v508_v62  ;;  %v359_v62 = vld [vmem:[%s2596_s12 + $0x3a0] sm:$0xff] }
 0x108   : > { %v1131_v4 = vpop.f32.mrf.mxu0  ;;  %v1531_v7 = vpop.f32.mrf.mxu1  ;;  %v519_v1 = vld [vmem:[%s2596_s12 + $0x8a0] sm:$0xff] }
 0x109   : > { %2077 = vst.msk [vmem:[%s3022_s16 + $0x18] sm:$0xff] %vm2073_vm14, %v1916_v0  ;;  %2157 = vst.msk [vmem:[%s3022_s16 + $0x298] sm:$0xff] %vm2073_vm14, %v1996_v3  ;;  %v522_v4 = vld [vmem:[%s2596_s12 + $0x8b8] sm:$0xff] }
 0x10a   : > { %v1134_v9 = vpop.f32.mrf.mxu0  ;;  %1373 = vmatmul.mubr.f32.gmra.mxu0 %v347_v2  ;;  %v1534_v11 = vpop.f32.mrf.mxu1  ;;  %1773 = vmatmul.mubr.f32.gmra.mxu1 %v507_v5  ;;  %v362_v2 = vld [vmem:[%s2596_s12 + $0x3b8] sm:$0xff] }
 0x10b   : > { %v1917_v10 = vmul.f32 0.04761905, %v1134_v9  ;;  %2389 = vmatprep.mubr.msk.f32.mxu0 %vm563_vm1, %v350_v6  ;;  %v1997_v13 = vmul.f32 0.04761905, %v1534_v11  ;;  %2469 = vmatprep.mubr.msk.f32.mxu1 %vm563_vm1, %v510_v8  ;;  %v361_v8 = vld [vmem:[%s2596_s12 + $0x3b0] sm:$0xff] }
 0x10c   : > { %v1136_v14 = vpop.f32.mrf.mxu0  ;;  %v1536_v17 = vpop.f32.mrf.mxu1  ;;  %v521_v11 = vld [vmem:[%s2596_s12 + $0x8b0] sm:$0xff] }
 0x10d   : > { %2078 = vst.msk [vmem:[%s3022_s16 + $0x20] sm:$0xff] %vm2073_vm14, %v1917_v10  ;;  %2158 = vst.msk [vmem:[%s3022_s16 + $0x2a0] sm:$0xff] %vm2073_vm14, %v1997_v13  ;;  %v524_v14 = vld [vmem:[%s2596_s12 + $0x8c8] sm:$0xff] }
 0x10e   : > { %v1139_v19 = vpop.f32.mrf.mxu0  ;;  %1378 = vmatmul.mubr.f32.gmra.mxu0 %v349_v12  ;;  %v1539_v21 = vpop.f32.mrf.mxu1  ;;  %1778 = vmatmul.mubr.f32.gmra.mxu1 %v509_v15  ;;  %v364_v12 = vld [vmem:[%s2596_s12 + $0x3c8] sm:$0xff] }
 0x10f   : > { %v1918_v20 = vmul.f32 0.04761905, %v1139_v19  ;;  %2390 = vmatprep.mubr.msk.f32.mxu0 %vm563_vm1, %v352_v16  ;;  %v1998_v23 = vmul.f32 0.04761905, %v1539_v21  ;;  %2470 = vmatprep.mubr.msk.f32.mxu1 %vm563_vm1, %v512_v18  ;;  %v363_v18 = vld [vmem:[%s2596_s12 + $0x3c0] sm:$0xff] }
 0x110   : > { %v1141_v24 = vpop.f32.mrf.mxu0  ;;  %v1541_v27 = vpop.f32.mrf.mxu1  ;;  %v523_v21 = vld [vmem:[%s2596_s12 + $0x8c0] sm:$0xff] }
 0x111   : > { %2079 = vst.msk [vmem:[%s3022_s16 + $0x28] sm:$0xff] %vm2073_vm14, %v1918_v20  ;;  %2159 = vst.msk [vmem:[%s3022_s16 + $0x2a8] sm:$0xff] %vm2073_vm14, %v1998_v23  ;;  %v526_v24 = vld [vmem:[%s2596_s12 + $0x8d8] sm:$0xff] }
 0x112   : > { %v1144_v29 = vpop.f32.mrf.mxu0  ;;  %1383 = vmatmul.mubr.f32.gmra.mxu0 %v351_v22  ;;  %v1544_v31 = vpop.f32.mrf.mxu1  ;;  %1783 = vmatmul.mubr.f32.gmra.mxu1 %v511_v25  ;;  %v366_v22 = vld [vmem:[%s2596_s12 + $0x3d8] sm:$0xff] }
 0x113   : > { %v1919_v30 = vmul.f32 0.04761905, %v1144_v29  ;;  %2391 = vmatprep.mubr.msk.f32.mxu0 %vm563_vm1, %v354_v26  ;;  %v1999_v33 = vmul.f32 0.04761905, %v1544_v31  ;;  %2471 = vmatprep.mubr.msk.f32.mxu1 %vm563_vm1, %v514_v28  ;;  %v365_v28 = vld [vmem:[%s2596_s12 + $0x3d0] sm:$0xff] }
 0x114   : > { %v1146_v34 = vpop.f32.mrf.mxu0  ;;  %v1546_v37 = vpop.f32.mrf.mxu1  ;;  %v525_v31 = vld [vmem:[%s2596_s12 + $0x8d0] sm:$0xff] }
 0x115   : > { %2080 = vst.msk [vmem:[%s3022_s16 + $0x30] sm:$0xff] %vm2073_vm14, %v1919_v30  ;;  %2160 = vst.msk [vmem:[%s3022_s16 + $0x2b0] sm:$0xff] %vm2073_vm14, %v1999_v33  ;;  %v528_v34 = vld [vmem:[%s2596_s12 + $0x8e8] sm:$0xff] }
 0x116   : > { %v1149_v39 = vpop.f32.mrf.mxu0  ;;  %1388 = vmatmul.mubr.f32.gmra.mxu0 %v353_v32  ;;  %v1549_v41 = vpop.f32.mrf.mxu1  ;;  %1788 = vmatmul.mubr.f32.gmra.mxu1 %v513_v35  ;;  %v368_v32 = vld [vmem:[%s2596_s12 + $0x3e8] sm:$0xff] }
 0x117   : > { %v1920_v40 = vmul.f32 0.04761905, %v1149_v39  ;;  %2392 = vmatprep.mubr.msk.f32.mxu0 %vm563_vm1, %v356_v36  ;;  %v2000_v43 = vmul.f32 0.04761905, %v1549_v41  ;;  %2472 = vmatprep.mubr.msk.f32.mxu1 %vm563_vm1, %v516_v38  ;;  %v367_v38 = vld [vmem:[%s2596_s12 + $0x3e0] sm:$0xff] }
 0x118   : > { %v1151_v44 = vpop.f32.mrf.mxu0  ;;  %v1551_v47 = vpop.f32.mrf.mxu1  ;;  %v527_v41 = vld [vmem:[%s2596_s12 + $0x8e0] sm:$0xff] }
 0x119   : > { %2081 = vst.msk [vmem:[%s3022_s16 + $0x38] sm:$0xff] %vm2073_vm14, %v1920_v40  ;;  %2161 = vst.msk [vmem:[%s3022_s16 + $0x2b8] sm:$0xff] %vm2073_vm14, %v2000_v43  ;;  %v530_v44 = vld [vmem:[%s2596_s12 + $0x8f8] sm:$0xff] }
 0x11a   : > { %v1154_v49 = vpop.f32.mrf.mxu0  ;;  %1393 = vmatmul.mubr.f32.gmra.mxu0 %v355_v42  ;;  %v1554_v51 = vpop.f32.mrf.mxu1  ;;  %1793 = vmatmul.mubr.f32.gmra.mxu1 %v515_v45  ;;  %v370_v42 = vld [vmem:[%s2596_s12 + $0x3f8] sm:$0xff] }
 0x11b   : > { %v1921_v50 = vmul.f32 0.04761905, %v1154_v49  ;;  %2393 = vmatprep.mubr.msk.f32.mxu0 %vm563_vm1, %v358_v46  ;;  %v2001_v53 = vmul.f32 0.04761905, %v1554_v51  ;;  %2473 = vmatprep.mubr.msk.f32.mxu1 %vm563_vm1, %v518_v48  ;;  %v369_v48 = vld [vmem:[%s2596_s12 + $0x3f0] sm:$0xff] }
 0x11c   : > { %v1156_v54 = vpop.f32.mrf.mxu0  ;;  %v1556_v57 = vpop.f32.mrf.mxu1  ;;  %v529_v51 = vld [vmem:[%s2596_s12 + $0x8f0] sm:$0xff] }
 0x11d   : > { %2082 = vst.msk [vmem:[%s3022_s16 + $0x40] sm:$0xff] %vm2073_vm14, %v1921_v50  ;;  %2162 = vst.msk [vmem:[%s3022_s16 + $0x2c0] sm:$0xff] %vm2073_vm14, %v2001_v53  ;;  %v532_v54 = vld [vmem:[%s2596_s12 + $0x908] sm:$0xff] }
 0x11e   : > { %v1159_v59 = vpop.f32.mrf.mxu0  ;;  %1398 = vmatmul.mubr.f32.gmra.mxu0 %v357_v52  ;;  %v1559_v61 = vpop.f32.mrf.mxu1  ;;  %1798 = vmatmul.mubr.f32.gmra.mxu1 %v517_v55  ;;  %v372_v52 = vld [vmem:[%s2596_s12 + $0x408] sm:$0xff] }
 0x11f   : > { %v1922_v60 = vmul.f32 0.04761905, %v1159_v59  ;;  %2394 = vmatprep.mubr.msk.f32.mxu0 %vm563_vm1, %v360_v56  ;;  %v2002_v63 = vmul.f32 0.04761905, %v1559_v61  ;;  %2474 = vmatprep.mubr.msk.f32.mxu1 %vm563_vm1, %v520_v58  ;;  %v371_v58 = vld [vmem:[%s2596_s12 + $0x400] sm:$0xff] }
 0x120   : > { %v1161_v0 = vpop.f32.mrf.mxu0  ;;  %v1561_v3 = vpop.f32.mrf.mxu1  ;;  %v531_v61 = vld [vmem:[%s2596_s12 + $0x900] sm:$0xff] }
 0x121   : > { %2083 = vst.msk [vmem:[%s3022_s16 + $0x48] sm:$0xff] %vm2073_vm14, %v1922_v60  ;;  %2163 = vst.msk [vmem:[%s3022_s16 + $0x2c8] sm:$0xff] %vm2073_vm14, %v2002_v63  ;;  %v534_v0 = vld [vmem:[%s2596_s12 + $0x918] sm:$0xff] }
 0x122   : > { %v1164_v5 = vpop.f32.mrf.mxu0  ;;  %1403 = vmatmul.mubr.f32.gmra.mxu0 %v359_v62  ;;  %v1564_v7 = vpop.f32.mrf.mxu1  ;;  %1803 = vmatmul.mubr.f32.gmra.mxu1 %v519_v1  ;;  %v374_v62 = vld [vmem:[%s2596_s12 + $0x418] sm:$0xff] }
 0x123   : > { %v1923_v6 = vmul.f32 0.04761905, %v1164_v5  ;;  %2395 = vmatprep.mubr.msk.f32.mxu0 %vm563_vm1, %v362_v2  ;;  %v2003_v9 = vmul.f32 0.04761905, %v1564_v7  ;;  %2475 = vmatprep.mubr.msk.f32.mxu1 %vm563_vm1, %v522_v4  ;;  %v373_v4 = vld [vmem:[%s2596_s12 + $0x410] sm:$0xff] }
 0x124   : > { %v1166_v10 = vpop.f32.mrf.mxu0  ;;  %v1566_v13 = vpop.f32.mrf.mxu1  ;;  %v533_v7 = vld [vmem:[%s2596_s12 + $0x910] sm:$0xff] }
 0x125   : > { %2084 = vst.msk [vmem:[%s3022_s16 + $0x50] sm:$0xff] %vm2073_vm14, %v1923_v6  ;;  %2164 = vst.msk [vmem:[%s3022_s16 + $0x2d0] sm:$0xff] %vm2073_vm14, %v2003_v9  ;;  %v536_v10 = vld [vmem:[%s2596_s12 + $0x928] sm:$0xff] }
 0x126   : > { %v1169_v15 = vpop.f32.mrf.mxu0  ;;  %1408 = vmatmul.mubr.f32.gmra.mxu0 %v361_v8  ;;  %v1569_v17 = vpop.f32.mrf.mxu1  ;;  %1808 = vmatmul.mubr.f32.gmra.mxu1 %v521_v11  ;;  %v376_v8 = vld [vmem:[%s2596_s12 + $0x428] sm:$0xff] }
 0x127   : > { %v1924_v16 = vmul.f32 0.04761905, %v1169_v15  ;;  %2396 = vmatprep.mubr.msk.f32.mxu0 %vm563_vm1, %v364_v12  ;;  %v2004_v19 = vmul.f32 0.04761905, %v1569_v17  ;;  %2476 = vmatprep.mubr.msk.f32.mxu1 %vm563_vm1, %v524_v14  ;;  %v375_v14 = vld [vmem:[%s2596_s12 + $0x420] sm:$0xff] }
 0x128   : > { %v1171_v20 = vpop.f32.mrf.mxu0  ;;  %v1571_v23 = vpop.f32.mrf.mxu1  ;;  %v535_v17 = vld [vmem:[%s2596_s12 + $0x920] sm:$0xff] }
 0x129   : > { %2085 = vst.msk [vmem:[%s3022_s16 + $0x58] sm:$0xff] %vm2073_vm14, %v1924_v16  ;;  %2165 = vst.msk [vmem:[%s3022_s16 + $0x2d8] sm:$0xff] %vm2073_vm14, %v2004_v19  ;;  %v538_v20 = vld [vmem:[%s2596_s12 + $0x938] sm:$0xff] }
 0x12a   : > { %v1174_v25 = vpop.f32.mrf.mxu0  ;;  %1413 = vmatmul.mubr.f32.gmra.mxu0 %v363_v18  ;;  %v1574_v27 = vpop.f32.mrf.mxu1  ;;  %1813 = vmatmul.mubr.f32.gmra.mxu1 %v523_v21  ;;  %v378_v18 = vld [vmem:[%s2596_s12 + $0x438] sm:$0xff] }
 0x12b   : > { %v1925_v26 = vmul.f32 0.04761905, %v1174_v25  ;;  %2397 = vmatprep.mubr.msk.f32.mxu0 %vm563_vm1, %v366_v22  ;;  %v2005_v29 = vmul.f32 0.04761905, %v1574_v27  ;;  %2477 = vmatprep.mubr.msk.f32.mxu1 %vm563_vm1, %v526_v24  ;;  %v377_v24 = vld [vmem:[%s2596_s12 + $0x430] sm:$0xff] }
 0x12c   : > { %v1176_v30 = vpop.f32.mrf.mxu0  ;;  %v1576_v33 = vpop.f32.mrf.mxu1  ;;  %v537_v27 = vld [vmem:[%s2596_s12 + $0x930] sm:$0xff] }
 0x12d   : > { %2086 = vst.msk [vmem:[%s3022_s16 + $0x60] sm:$0xff] %vm2073_vm14, %v1925_v26  ;;  %2166 = vst.msk [vmem:[%s3022_s16 + $0x2e0] sm:$0xff] %vm2073_vm14, %v2005_v29  ;;  %v540_v30 = vld [vmem:[%s2596_s12 + $0x948] sm:$0xff] }
 0x12e   : > { %v1179_v35 = vpop.f32.mrf.mxu0  ;;  %1418 = vmatmul.mubr.f32.gmra.mxu0 %v365_v28  ;;  %v1579_v37 = vpop.f32.mrf.mxu1  ;;  %1818 = vmatmul.mubr.f32.gmra.mxu1 %v525_v31  ;;  %v380_v28 = vld [vmem:[%s2596_s12 + $0x448] sm:$0xff] }
 0x12f   : > { %v1926_v36 = vmul.f32 0.04761905, %v1179_v35  ;;  %2398 = vmatprep.mubr.msk.f32.mxu0 %vm563_vm1, %v368_v32  ;;  %v2006_v39 = vmul.f32 0.04761905, %v1579_v37  ;;  %2478 = vmatprep.mubr.msk.f32.mxu1 %vm563_vm1, %v528_v34  ;;  %v379_v34 = vld [vmem:[%s2596_s12 + $0x440] sm:$0xff] }
 0x130   : > { %v1181_v40 = vpop.f32.mrf.mxu0  ;;  %v1581_v43 = vpop.f32.mrf.mxu1  ;;  %v539_v37 = vld [vmem:[%s2596_s12 + $0x940] sm:$0xff] }
 0x131   : > { %2087 = vst.msk [vmem:[%s3022_s16 + $0x68] sm:$0xff] %vm2073_vm14, %v1926_v36  ;;  %2167 = vst.msk [vmem:[%s3022_s16 + $0x2e8] sm:$0xff] %vm2073_vm14, %v2006_v39  ;;  %v542_v40 = vld [vmem:[%s2596_s12 + $0x958] sm:$0xff] }
 0x132   : > { %v1184_v45 = vpop.f32.mrf.mxu0  ;;  %1423 = vmatmul.mubr.f32.gmra.mxu0 %v367_v38  ;;  %v1584_v47 = vpop.f32.mrf.mxu1  ;;  %1823 = vmatmul.mubr.f32.gmra.mxu1 %v527_v41  ;;  %v382_v38 = vld [vmem:[%s2596_s12 + $0x458] sm:$0xff] }
 0x133   : > { %v1927_v46 = vmul.f32 0.04761905, %v1184_v45  ;;  %2399 = vmatprep.mubr.msk.f32.mxu0 %vm563_vm1, %v370_v42  ;;  %v2007_v49 = vmul.f32 0.04761905, %v1584_v47  ;;  %2479 = vmatprep.mubr.msk.f32.mxu1 %vm563_vm1, %v530_v44  ;;  %v381_v44 = vld [vmem:[%s2596_s12 + $0x450] sm:$0xff] }
 0x134   : > { %v1186_v50 = vpop.f32.mrf.mxu0  ;;  %v1586_v53 = vpop.f32.mrf.mxu1  ;;  %v541_v47 = vld [vmem:[%s2596_s12 + $0x950] sm:$0xff] }
 0x135   : > { %2088 = vst.msk [vmem:[%s3022_s16 + $0x70] sm:$0xff] %vm2073_vm14, %v1927_v46  ;;  %2168 = vst.msk [vmem:[%s3022_s16 + $0x2f0] sm:$0xff] %vm2073_vm14, %v2007_v49  ;;  %v544_v50 = vld [vmem:[%s2596_s12 + $0x968] sm:$0xff] }
 0x136   : > { %v1189_v55 = vpop.f32.mrf.mxu0  ;;  %1428 = vmatmul.mubr.f32.gmra.mxu0 %v369_v48  ;;  %v1589_v57 = vpop.f32.mrf.mxu1  ;;  %1828 = vmatmul.mubr.f32.gmra.mxu1 %v529_v51  ;;  %v384_v48 = vld [vmem:[%s2596_s12 + $0x468] sm:$0xff] }
 0x137   : > { %v1928_v56 = vmul.f32 0.04761905, %v1189_v55  ;;  %2400 = vmatprep.mubr.msk.f32.mxu0 %vm563_vm1, %v372_v52  ;;  %v2008_v59 = vmul.f32 0.04761905, %v1589_v57  ;;  %2480 = vmatprep.mubr.msk.f32.mxu1 %vm563_vm1, %v532_v54  ;;  %v383_v54 = vld [vmem:[%s2596_s12 + $0x460] sm:$0xff] }
 0x138   : > { %v1191_v60 = vpop.f32.mrf.mxu0  ;;  %v1591_v63 = vpop.f32.mrf.mxu1  ;;  %v543_v57 = vld [vmem:[%s2596_s12 + $0x960] sm:$0xff] }
 0x139   : > { %2089 = vst.msk [vmem:[%s3022_s16 + $0x78] sm:$0xff] %vm2073_vm14, %v1928_v56  ;;  %2169 = vst.msk [vmem:[%s3022_s16 + $0x2f8] sm:$0xff] %vm2073_vm14, %v2008_v59  ;;  %v546_v60 = vld [vmem:[%s2596_s12 + $0x978] sm:$0xff] }
 0x13a   : > { %v1194_v1 = vpop.f32.mrf.mxu0  ;;  %1433 = vmatmul.mubr.f32.gmra.mxu0 %v371_v58  ;;  %v1594_v3 = vpop.f32.mrf.mxu1  ;;  %1833 = vmatmul.mubr.f32.gmra.mxu1 %v531_v61  ;;  %v386_v58 = vld [vmem:[%s2596_s12 + $0x478] sm:$0xff] }
 0x13b   : > { %v1929_v2 = vmul.f32 0.04761905, %v1194_v1  ;;  %2401 = vmatprep.mubr.msk.f32.mxu0 %vm563_vm1, %v374_v62  ;;  %v2009_v5 = vmul.f32 0.04761905, %v1594_v3  ;;  %2481 = vmatprep.mubr.msk.f32.mxu1 %vm563_vm1, %v534_v0  ;;  %v385_v0 = vld [vmem:[%s2596_s12 + $0x470] sm:$0xff] }
 0x13c   : > { %v1196_v6 = vpop.f32.mrf.mxu0  ;;  %v1596_v9 = vpop.f32.mrf.mxu1  ;;  %v545_v3 = vld [vmem:[%s2596_s12 + $0x970] sm:$0xff] }
 0x13d   : > { %2090 = vst.msk [vmem:[%s3022_s16 + $0x80] sm:$0xff] %vm2073_vm14, %v1929_v2  ;;  %2170 = vst.msk [vmem:[%s3022_s16 + $0x300] sm:$0xff] %vm2073_vm14, %v2009_v5  ;;  %v548_v6 = vld [vmem:[%s2596_s12 + $0x988] sm:$0xff] }
 0x13e   : > { %v1199_v11 = vpop.f32.mrf.mxu0  ;;  %1438 = vmatmul.mubr.f32.gmra.mxu0 %v373_v4  ;;  %v1599_v13 = vpop.f32.mrf.mxu1  ;;  %1838 = vmatmul.mubr.f32.gmra.mxu1 %v533_v7  ;;  %v388_v4 = vld [vmem:[%s2596_s12 + $0x488] sm:$0xff] }
 0x13f   : > { %v1930_v12 = vmul.f32 0.04761905, %v1199_v11  ;;  %2402 = vmatprep.mubr.msk.f32.mxu0 %vm563_vm1, %v376_v8  ;;  %v2010_v15 = vmul.f32 0.04761905, %v1599_v13  ;;  %2482 = vmatprep.mubr.msk.f32.mxu1 %vm563_vm1, %v536_v10  ;;  %v387_v10 = vld [vmem:[%s2596_s12 + $0x480] sm:$0xff] }
 0x140   : > { %v1201_v16 = vpop.f32.mrf.mxu0  ;;  %v1601_v19 = vpop.f32.mrf.mxu1  ;;  %v547_v13 = vld [vmem:[%s2596_s12 + $0x980] sm:$0xff] }
 0x141   : > { %2091 = vst.msk [vmem:[%s3022_s16 + $0x88] sm:$0xff] %vm2073_vm14, %v1930_v12  ;;  %2171 = vst.msk [vmem:[%s3022_s16 + $0x308] sm:$0xff] %vm2073_vm14, %v2010_v15  ;;  %v550_v16 = vld [vmem:[%s2596_s12 + $0x998] sm:$0xff] }
 0x142   : > { %v1204_v21 = vpop.f32.mrf.mxu0  ;;  %1443 = vmatmul.mubr.f32.gmra.mxu0 %v375_v14  ;;  %v1604_v23 = vpop.f32.mrf.mxu1  ;;  %1843 = vmatmul.mubr.f32.gmra.mxu1 %v535_v17  ;;  %v390_v14 = vld [vmem:[%s2596_s12 + $0x498] sm:$0xff] }
 0x143   : > { %v1931_v22 = vmul.f32 0.04761905, %v1204_v21  ;;  %2403 = vmatprep.mubr.msk.f32.mxu0 %vm563_vm1, %v378_v18  ;;  %v2011_v25 = vmul.f32 0.04761905, %v1604_v23  ;;  %2483 = vmatprep.mubr.msk.f32.mxu1 %vm563_vm1, %v538_v20  ;;  %v389_v20 = vld [vmem:[%s2596_s12 + $0x490] sm:$0xff] }
 0x144   : > { %v1206_v26 = vpop.f32.mrf.mxu0  ;;  %v1606_v29 = vpop.f32.mrf.mxu1  ;;  %v549_v23 = vld [vmem:[%s2596_s12 + $0x990] sm:$0xff] }
 0x145   : > { %2092 = vst.msk [vmem:[%s3022_s16 + $0x90] sm:$0xff] %vm2073_vm14, %v1931_v22  ;;  %2172 = vst.msk [vmem:[%s3022_s16 + $0x310] sm:$0xff] %vm2073_vm14, %v2011_v25  ;;  %v552_v26 = vld [vmem:[%s2596_s12 + $0x9a8] sm:$0xff] }
 0x146   : > { %v1209_v31 = vpop.f32.mrf.mxu0  ;;  %1448 = vmatmul.mubr.f32.gmra.mxu0 %v377_v24  ;;  %v1609_v33 = vpop.f32.mrf.mxu1  ;;  %1848 = vmatmul.mubr.f32.gmra.mxu1 %v537_v27  ;;  %v392_v24 = vld [vmem:[%s2596_s12 + $0x4a8] sm:$0xff] }
 0x147   : > { %v1932_v32 = vmul.f32 0.04761905, %v1209_v31  ;;  %2404 = vmatprep.mubr.msk.f32.mxu0 %vm563_vm1, %v380_v28  ;;  %v2012_v35 = vmul.f32 0.04761905, %v1609_v33  ;;  %2484 = vmatprep.mubr.msk.f32.mxu1 %vm563_vm1, %v540_v30  ;;  %v391_v30 = vld [vmem:[%s2596_s12 + $0x4a0] sm:$0xff] }
 0x148   : > { %v1211_v36 = vpop.f32.mrf.mxu0  ;;  %v1611_v39 = vpop.f32.mrf.mxu1  ;;  %v551_v33 = vld [vmem:[%s2596_s12 + $0x9a0] sm:$0xff] }
 0x149   : > { %2093 = vst.msk [vmem:[%s3022_s16 + $0x98] sm:$0xff] %vm2073_vm14, %v1932_v32  ;;  %2173 = vst.msk [vmem:[%s3022_s16 + $0x318] sm:$0xff] %vm2073_vm14, %v2012_v35  ;;  %v554_v36 = vld [vmem:[%s2596_s12 + $0x9b8] sm:$0xff] }
 0x14a   : > { %v1214_v41 = vpop.f32.mrf.mxu0  ;;  %1453 = vmatmul.mubr.f32.gmra.mxu0 %v379_v34  ;;  %v1614_v43 = vpop.f32.mrf.mxu1  ;;  %1853 = vmatmul.mubr.f32.gmra.mxu1 %v539_v37  ;;  %v394_v34 = vld [vmem:[%s2596_s12 + $0x4b8] sm:$0xff] }
 0x14b   : > { %v1933_v42 = vmul.f32 0.04761905, %v1214_v41  ;;  %2405 = vmatprep.mubr.msk.f32.mxu0 %vm563_vm1, %v382_v38  ;;  %v2013_v45 = vmul.f32 0.04761905, %v1614_v43  ;;  %2485 = vmatprep.mubr.msk.f32.mxu1 %vm563_vm1, %v542_v40  ;;  %v393_v40 = vld [vmem:[%s2596_s12 + $0x4b0] sm:$0xff] }
 0x14c   : > { %v1216_v46 = vpop.f32.mrf.mxu0  ;;  %v1616_v49 = vpop.f32.mrf.mxu1  ;;  %v553_v43 = vld [vmem:[%s2596_s12 + $0x9b0] sm:$0xff] }
 0x14d   : > { %2094 = vst.msk [vmem:[%s3022_s16 + $0xa0] sm:$0xff] %vm2073_vm14, %v1933_v42  ;;  %2174 = vst.msk [vmem:[%s3022_s16 + $0x320] sm:$0xff] %vm2073_vm14, %v2013_v45  ;;  %v556_v46 = vld [vmem:[%s2596_s12 + $0x9c8] sm:$0xff] }
 0x14e   : > { %v1219_v51 = vpop.f32.mrf.mxu0  ;;  %1458 = vmatmul.mubr.f32.gmra.mxu0 %v381_v44  ;;  %v1619_v53 = vpop.f32.mrf.mxu1  ;;  %1858 = vmatmul.mubr.f32.gmra.mxu1 %v541_v47  ;;  %v396_v44 = vld [vmem:[%s2596_s12 + $0x4c8] sm:$0xff] }
 0x14f   : > { %v1934_v52 = vmul.f32 0.04761905, %v1219_v51  ;;  %2406 = vmatprep.mubr.msk.f32.mxu0 %vm563_vm1, %v384_v48  ;;  %v2014_v55 = vmul.f32 0.04761905, %v1619_v53  ;;  %2486 = vmatprep.mubr.msk.f32.mxu1 %vm563_vm1, %v544_v50  ;;  %v395_v50 = vld [vmem:[%s2596_s12 + $0x4c0] sm:$0xff] }
 0x150   : > { %v1221_v56 = vpop.f32.mrf.mxu0  ;;  %v1621_v59 = vpop.f32.mrf.mxu1  ;;  %v555_v53 = vld [vmem:[%s2596_s12 + $0x9c0] sm:$0xff] }
 0x151   : > { %2095 = vst.msk [vmem:[%s3022_s16 + $0xa8] sm:$0xff] %vm2073_vm14, %v1934_v52  ;;  %2175 = vst.msk [vmem:[%s3022_s16 + $0x328] sm:$0xff] %vm2073_vm14, %v2014_v55  ;;  %v558_v56 = vld [vmem:[%s2596_s12 + $0x9d8] sm:$0xff] }
 0x152   : > { %v1224_v61 = vpop.f32.mrf.mxu0  ;;  %1463 = vmatmul.mubr.f32.gmra.mxu0 %v383_v54  ;;  %v1624_v63 = vpop.f32.mrf.mxu1  ;;  %1863 = vmatmul.mubr.f32.gmra.mxu1 %v543_v57  ;;  %v398_v54 = vld [vmem:[%s2596_s12 + $0x4d8] sm:$0xff] }
 0x153   : > { %v1935_v62 = vmul.f32 0.04761905, %v1224_v61  ;;  %2407 = vmatprep.mubr.msk.f32.mxu0 %vm563_vm1, %v386_v58  ;;  %v2015_v1 = vmul.f32 0.04761905, %v1624_v63  ;;  %2487 = vmatprep.mubr.msk.f32.mxu1 %vm563_vm1, %v546_v60  ;;  %v397_v60 = vld [vmem:[%s2596_s12 + $0x4d0] sm:$0xff] }
 0x154   : > { %v1226_v2 = vpop.f32.mrf.mxu0  ;;  %v1626_v5 = vpop.f32.mrf.mxu1  ;;  %v557_v63 = vld [vmem:[%s2596_s12 + $0x9d0] sm:$0xff] }
 0x155   : > { %2096 = vst.msk [vmem:[%s3022_s16 + $0xb0] sm:$0xff] %vm2073_vm14, %v1935_v62  ;;  %2176 = vst.msk [vmem:[%s3022_s16 + $0x330] sm:$0xff] %vm2073_vm14, %v2015_v1  ;;  %v560_v2 = vld [vmem:[%s2596_s12 + $0x9e8] sm:$0xff] }
 0x156   : > { %v1229_v7 = vpop.f32.mrf.mxu0  ;;  %1468 = vmatmul.mubr.f32.gmra.mxu0 %v385_v0  ;;  %v1629_v9 = vpop.f32.mrf.mxu1  ;;  %1868 = vmatmul.mubr.f32.gmra.mxu1 %v545_v3  ;;  %v400_v0 = vld [vmem:[%s2596_s12 + $0x4e8] sm:$0xff] }
 0x157   : > { %v1936_v8 = vmul.f32 0.04761905, %v1229_v7  ;;  %2408 = vmatprep.mubr.msk.f32.mxu0 %vm563_vm1, %v388_v4  ;;  %v2016_v11 = vmul.f32 0.04761905, %v1629_v9  ;;  %2488 = vmatprep.mubr.msk.f32.mxu1 %vm563_vm1, %v548_v6  ;;  %v399_v6 = vld [vmem:[%s2596_s12 + $0x4e0] sm:$0xff] }
 0x158   : > { %v1231_v12 = vpop.f32.mrf.mxu0  ;;  %v1631_v15 = vpop.f32.mrf.mxu1  ;;  %v559_v9 = vld [vmem:[%s2596_s12 + $0x9e0] sm:$0xff] }
 0x159   : > { %2097 = vst.msk [vmem:[%s3022_s16 + $0xb8] sm:$0xff] %vm2073_vm14, %v1936_v8  ;;  %2177 = vst.msk [vmem:[%s3022_s16 + $0x338] sm:$0xff] %vm2073_vm14, %v2016_v11  ;;  %v562_v12 = vld [vmem:[%s2596_s12 + $0x9f8] sm:$0xff] }
 0x15a   : > { %v1234_v17 = vpop.f32.mrf.mxu0  ;;  %1473 = vmatmul.mubr.f32.gmra.mxu0 %v387_v10  ;;  %v1634_v19 = vpop.f32.mrf.mxu1  ;;  %1873 = vmatmul.mubr.f32.gmra.mxu1 %v547_v13  ;;  %v402_v10 = vld [vmem:[%s2596_s12 + $0x4f8] sm:$0xff] }
 0x15b   : > { %v1937_v18 = vmul.f32 0.04761905, %v1234_v17  ;;  %2409 = vmatprep.mubr.msk.f32.mxu0 %vm563_vm1, %v390_v14  ;;  %v2017_v21 = vmul.f32 0.04761905, %v1634_v19  ;;  %2489 = vmatprep.mubr.msk.f32.mxu1 %vm563_vm1, %v550_v16  ;;  %v401_v16 = vld [vmem:[%s2596_s12 + $0x4f0] sm:$0xff] }
 0x15c   : > { %v1236_v22 = vpop.f32.mrf.mxu0  ;;  %v1636_v25 = vpop.f32.mrf.mxu1  ;;  %v561_v19 = vld [vmem:[%s2596_s12 + $0x9f0] sm:$0xff] }
 0x15d   : > { %2098 = vst.msk [vmem:[%s3022_s16 + $0xc0] sm:$0xff] %vm2073_vm14, %v1937_v18  ;;  %2178 = vst.msk [vmem:[%s3022_s16 + $0x340] sm:$0xff] %vm2073_vm14, %v2017_v21 }
 0x15e   : > { %v1239_v27 = vpop.f32.mrf.mxu0  ;;  %1478 = vmatmul.mubr.f32.gmra.mxu0 %v389_v20  ;;  %v1639_v29 = vpop.f32.mrf.mxu1  ;;  %1878 = vmatmul.mubr.f32.gmra.mxu1 %v549_v23 }
 0x15f   : > { %v1938_v28 = vmul.f32 0.04761905, %v1239_v27  ;;  %2410 = vmatprep.mubr.msk.f32.mxu0 %vm563_vm1, %v392_v24  ;;  %v2018_v31 = vmul.f32 0.04761905, %v1639_v29  ;;  %2490 = vmatprep.mubr.msk.f32.mxu1 %vm563_vm1, %v552_v26 }
 0x160   : > { %v1241_v32 = vpop.f32.mrf.mxu0  ;;  %v1641_v35 = vpop.f32.mrf.mxu1 }
 0x161   : > { %2099 = vst.msk [vmem:[%s3022_s16 + $0xc8] sm:$0xff] %vm2073_vm14, %v1938_v28  ;;  %2179 = vst.msk [vmem:[%s3022_s16 + $0x348] sm:$0xff] %vm2073_vm14, %v2018_v31 }
 0x162   : > { %v1244_v37 = vpop.f32.mrf.mxu0  ;;  %1483 = vmatmul.mubr.f32.gmra.mxu0 %v391_v30  ;;  %v1644_v39 = vpop.f32.mrf.mxu1  ;;  %1883 = vmatmul.mubr.f32.gmra.mxu1 %v551_v33 }
 0x163   : > { %v1939_v38 = vmul.f32 0.04761905, %v1244_v37  ;;  %2411 = vmatprep.mubr.msk.f32.mxu0 %vm563_vm1, %v394_v34  ;;  %v2019_v41 = vmul.f32 0.04761905, %v1644_v39  ;;  %2491 = vmatprep.mubr.msk.f32.mxu1 %vm563_vm1, %v554_v36 }
 0x164   : > { %v1246_v42 = vpop.f32.mrf.mxu0  ;;  %v1646_v45 = vpop.f32.mrf.mxu1 }
 0x165   : > { %2100 = vst.msk [vmem:[%s3022_s16 + $0xd0] sm:$0xff] %vm2073_vm14, %v1939_v38  ;;  %2180 = vst.msk [vmem:[%s3022_s16 + $0x350] sm:$0xff] %vm2073_vm14, %v2019_v41 }
 0x166   : > { %v1249_v47 = vpop.f32.mrf.mxu0  ;;  %1488 = vmatmul.mubr.f32.gmra.mxu0 %v393_v40  ;;  %v1649_v49 = vpop.f32.mrf.mxu1  ;;  %1888 = vmatmul.mubr.f32.gmra.mxu1 %v553_v43 }
 0x167   : > { %v1940_v48 = vmul.f32 0.04761905, %v1249_v47  ;;  %2412 = vmatprep.mubr.msk.f32.mxu0 %vm563_vm1, %v396_v44  ;;  %v2020_v51 = vmul.f32 0.04761905, %v1649_v49  ;;  %2492 = vmatprep.mubr.msk.f32.mxu1 %vm563_vm1, %v556_v46 }
 0x168   : > { %v1251_v52 = vpop.f32.mrf.mxu0  ;;  %v1651_v55 = vpop.f32.mrf.mxu1 }
 0x169   : > { %2101 = vst.msk [vmem:[%s3022_s16 + $0xd8] sm:$0xff] %vm2073_vm14, %v1940_v48  ;;  %2181 = vst.msk [vmem:[%s3022_s16 + $0x358] sm:$0xff] %vm2073_vm14, %v2020_v51 }
 0x16a   : > { %v1254_v57 = vpop.f32.mrf.mxu0  ;;  %1493 = vmatmul.mubr.f32.gmra.mxu0 %v395_v50  ;;  %v1654_v59 = vpop.f32.mrf.mxu1  ;;  %1893 = vmatmul.mubr.f32.gmra.mxu1 %v555_v53 }
 0x16b   : > { %v1941_v58 = vmul.f32 0.04761905, %v1254_v57  ;;  %2413 = vmatprep.mubr.msk.f32.mxu0 %vm563_vm1, %v398_v54  ;;  %v2021_v61 = vmul.f32 0.04761905, %v1654_v59  ;;  %2493 = vmatprep.mubr.msk.f32.mxu1 %vm563_vm1, %v558_v56 }
 0x16c   : > { %v1256_v62 = vpop.f32.mrf.mxu0  ;;  %v1656_v1 = vpop.f32.mrf.mxu1 }
 0x16d   : > { %2102 = vst.msk [vmem:[%s3022_s16 + $0xe0] sm:$0xff] %vm2073_vm14, %v1941_v58  ;;  %2182 = vst.msk [vmem:[%s3022_s16 + $0x360] sm:$0xff] %vm2073_vm14, %v2021_v61 }
 0x16e   : > { %v1259_v3 = vpop.f32.mrf.mxu0  ;;  %1498 = vmatmul.mubr.f32.gmra.mxu0 %v397_v60  ;;  %v1659_v5 = vpop.f32.mrf.mxu1  ;;  %1898 = vmatmul.mubr.f32.gmra.mxu1 %v557_v63 }
 0x16f   : > { %v1942_v4 = vmul.f32 0.04761905, %v1259_v3  ;;  %2414 = vmatprep.mubr.msk.f32.mxu0 %vm563_vm1, %v400_v0  ;;  %v2022_v7 = vmul.f32 0.04761905, %v1659_v5  ;;  %2494 = vmatprep.mubr.msk.f32.mxu1 %vm563_vm1, %v560_v2 }
 0x170   : > { %v1261_v8 = vpop.f32.mrf.mxu0  ;;  %v1661_v11 = vpop.f32.mrf.mxu1 }
 0x171   : > { %2103 = vst.msk [vmem:[%s3022_s16 + $0xe8] sm:$0xff] %vm2073_vm14, %v1942_v4  ;;  %2183 = vst.msk [vmem:[%s3022_s16 + $0x368] sm:$0xff] %vm2073_vm14, %v2022_v7 }
 0x172   : > { %v1264_v13 = vpop.f32.mrf.mxu0  ;;  %1503 = vmatmul.mubr.f32.gmra.mxu0 %v399_v6  ;;  %v1664_v15 = vpop.f32.mrf.mxu1  ;;  %1903 = vmatmul.mubr.f32.gmra.mxu1 %v559_v9 }
 0x173   : > { %v1943_v14 = vmul.f32 0.04761905, %v1264_v13  ;;  %2415 = vmatprep.mubr.msk.f32.mxu0 %vm563_vm1, %v402_v10  ;;  %v2023_v17 = vmul.f32 0.04761905, %v1664_v15  ;;  %2495 = vmatprep.mubr.msk.f32.mxu1 %vm563_vm1, %v562_v12 }
 0x174   : > { %v1266_v18 = vpop.f32.mrf.mxu0  ;;  %v1666_v20 = vpop.f32.mrf.mxu1 }
 0x175   : > { %2104 = vst.msk [vmem:[%s3022_s16 + $0xf0] sm:$0xff] %vm2073_vm14, %v1943_v14  ;;  %2184 = vst.msk [vmem:[%s3022_s16 + $0x370] sm:$0xff] %vm2073_vm14, %v2023_v17 }
 0x176   : > { %v1269_v21 = vpop.f32.mrf.mxu0  ;;  %1508 = vmatmul.mubr.f32.gmra.mxu0 %v401_v16  ;;  %v1669_v23 = vpop.f32.mrf.mxu1  ;;  %1908 = vmatmul.mubr.f32.gmra.mxu1 %v561_v19 }
 0x177   : > { %v1944_v22 = vmul.f32 0.04761905, %v1269_v21  ;;  %v2024_v24 = vmul.f32 0.04761905, %v1669_v23 }
 0x178   : > { %v1271_v25 = vpop.f32.mrf.mxu0  ;;  %v1671_v26 = vpop.f32.mrf.mxu1 }
 0x179   : > { %2105 = vst.msk [vmem:[%s3022_s16 + $0xf8] sm:$0xff] %vm2073_vm14, %v1944_v22  ;;  %2185 = vst.msk [vmem:[%s3022_s16 + $0x378] sm:$0xff] %vm2073_vm14, %v2024_v24 }
 0x17a   : > { %v1274_v27 = vpop.f32.mrf.mxu0  ;;  %v1674_v29 = vpop.f32.mrf.mxu1 }
 0x17b   : > { %v1945_v28 = vmul.f32 0.04761905, %v1274_v27  ;;  %v2025_v30 = vmul.f32 0.04761905, %v1674_v29 }
 0x17c   : > { %v1276_v31 = vpop.f32.mrf.mxu0  ;;  %v1676_v32 = vpop.f32.mrf.mxu1 }
 0x17d   : > { %2106 = vst.msk [vmem:[%s3022_s16 + $0x100] sm:$0xff] %vm2073_vm14, %v1945_v28  ;;  %2186 = vst.msk [vmem:[%s3022_s16 + $0x380] sm:$0xff] %vm2073_vm14, %v2025_v30 }
 0x17e   : > { %v1279_v33 = vpop.f32.mrf.mxu0  ;;  %v1679_v35 = vpop.f32.mrf.mxu1 }
 0x17f   : > { %v1946_v34 = vmul.f32 0.04761905, %v1279_v33  ;;  %v2026_v36 = vmul.f32 0.04761905, %v1679_v35 }
 0x180   : > { %v1281_v37 = vpop.f32.mrf.mxu0  ;;  %v1681_v38 = vpop.f32.mrf.mxu1 }
 0x181   : > { %2107 = vst.msk [vmem:[%s3022_s16 + $0x108] sm:$0xff] %vm2073_vm14, %v1946_v34  ;;  %2187 = vst.msk [vmem:[%s3022_s16 + $0x388] sm:$0xff] %vm2073_vm14, %v2026_v36 }
 0x182   : > { %v1284_v39 = vpop.f32.mrf.mxu0  ;;  %v1684_v41 = vpop.f32.mrf.mxu1 }
 0x183   : > { %v1947_v40 = vmul.f32 0.04761905, %v1284_v39  ;;  %v2027_v42 = vmul.f32 0.04761905, %v1684_v41 }
 0x184   : > { %v1286_v43 = vpop.f32.mrf.mxu0  ;;  %v1686_v44 = vpop.f32.mrf.mxu1 }
 0x185   : > { %2108 = vst.msk [vmem:[%s3022_s16 + $0x110] sm:$0xff] %vm2073_vm14, %v1947_v40  ;;  %2188 = vst.msk [vmem:[%s3022_s16 + $0x390] sm:$0xff] %vm2073_vm14, %v2027_v42 }
 0x186   : > { %v1289_v45 = vpop.f32.mrf.mxu0  ;;  %v1689_v47 = vpop.f32.mrf.mxu1 }
 0x187   : > { %v1948_v46 = vmul.f32 0.04761905, %v1289_v45  ;;  %v2028_v48 = vmul.f32 0.04761905, %v1689_v47 }
 0x188   : > { %v1291_v49 = vpop.f32.mrf.mxu0  ;;  %v1691_v50 = vpop.f32.mrf.mxu1 }
 0x189   : > { %2109 = vst.msk [vmem:[%s3022_s16 + $0x118] sm:$0xff] %vm2073_vm14, %v1948_v46  ;;  %2189 = vst.msk [vmem:[%s3022_s16 + $0x398] sm:$0xff] %vm2073_vm14, %v2028_v48 }
 0x18a   : > { %v1294_v51 = vpop.f32.mrf.mxu0  ;;  %v1694_v53 = vpop.f32.mrf.mxu1 }
 0x18b   : > { %v1949_v52 = vmul.f32 0.04761905, %v1294_v51  ;;  %v2029_v54 = vmul.f32 0.04761905, %v1694_v53 }
 0x18c   : > { %v1296_v55 = vpop.f32.mrf.mxu0  ;;  %v1696_v56 = vpop.f32.mrf.mxu1 }
 0x18d   : > { %2110 = vst.msk [vmem:[%s3022_s16 + $0x120] sm:$0xff] %vm2073_vm14, %v1949_v52  ;;  %2190 = vst.msk [vmem:[%s3022_s16 + $0x3a0] sm:$0xff] %vm2073_vm14, %v2029_v54 }
 0x18e   : > { %v1299_v57 = vpop.f32.mrf.mxu0  ;;  %v1699_v59 = vpop.f32.mrf.mxu1 }
 0x18f   : > { %v1950_v58 = vmul.f32 0.04761905, %v1299_v57  ;;  %v2030_v60 = vmul.f32 0.04761905, %v1699_v59 }
 0x190   : > { %v1301_v61 = vpop.f32.mrf.mxu0  ;;  %v1701_v62 = vpop.f32.mrf.mxu1 }
 0x191   : > { %2111 = vst.msk [vmem:[%s3022_s16 + $0x128] sm:$0xff] %vm2073_vm14, %v1950_v58  ;;  %2191 = vst.msk [vmem:[%s3022_s16 + $0x3a8] sm:$0xff] %vm2073_vm14, %v2030_v60 }
 0x192   : > { %v1304_v63 = vpop.f32.mrf.mxu0  ;;  %v1704_v1 = vpop.f32.mrf.mxu1 }
 0x193   : > { %v1951_v0 = vmul.f32 0.04761905, %v1304_v63  ;;  %v2031_v2 = vmul.f32 0.04761905, %v1704_v1 }
 0x194   : > { %v1306_v3 = vpop.f32.mrf.mxu0  ;;  %v1706_v4 = vpop.f32.mrf.mxu1 }
 0x195   : > { %2112 = vst.msk [vmem:[%s3022_s16 + $0x130] sm:$0xff] %vm2073_vm14, %v1951_v0  ;;  %2192 = vst.msk [vmem:[%s3022_s16 + $0x3b0] sm:$0xff] %vm2073_vm14, %v2031_v2 }
 0x196   : > { %v1309_v5 = vpop.f32.mrf.mxu0  ;;  %v1709_v7 = vpop.f32.mrf.mxu1 }
 0x197   : > { %v1952_v6 = vmul.f32 0.04761905, %v1309_v5  ;;  %v2032_v8 = vmul.f32 0.04761905, %v1709_v7 }
 0x198   : > { %v1311_v9 = vpop.f32.mrf.mxu0  ;;  %v1711_v10 = vpop.f32.mrf.mxu1 }
 0x199   : > { %2113 = vst.msk [vmem:[%s3022_s16 + $0x138] sm:$0xff] %vm2073_vm14, %v1952_v6  ;;  %2193 = vst.msk [vmem:[%s3022_s16 + $0x3b8] sm:$0xff] %vm2073_vm14, %v2032_v8 }
 0x19a   : > { %v1314_v11 = vpop.f32.mrf.mxu0  ;;  %v1714_v13 = vpop.f32.mrf.mxu1 }
 0x19b   : > { %v1953_v12 = vmul.f32 0.04761905, %v1314_v11  ;;  %v2033_v14 = vmul.f32 0.04761905, %v1714_v13 }
 0x19c   : > { %v1316_v15 = vpop.f32.mrf.mxu0  ;;  %v1716_v16 = vpop.f32.mrf.mxu1 }
 0x19d   : > { %2114 = vst.msk [vmem:[%s3022_s16 + $0x140] sm:$0xff] %vm2073_vm14, %v1953_v12  ;;  %2194 = vst.msk [vmem:[%s3022_s16 + $0x3c0] sm:$0xff] %vm2073_vm14, %v2033_v14 }
 0x19e   : > { %v1319_v17 = vpop.f32.mrf.mxu0  ;;  %v1719_v19 = vpop.f32.mrf.mxu1 }
 0x19f   : > { %v1954_v18 = vmul.f32 0.04761905, %v1319_v17  ;;  %v2034_v20 = vmul.f32 0.04761905, %v1719_v19 }
 0x1a0   : > { %v1321_v21 = vpop.f32.mrf.mxu0  ;;  %v1721_v22 = vpop.f32.mrf.mxu1 }
 0x1a1   : > { %2115 = vst.msk [vmem:[%s3022_s16 + $0x148] sm:$0xff] %vm2073_vm14, %v1954_v18  ;;  %2195 = vst.msk [vmem:[%s3022_s16 + $0x3c8] sm:$0xff] %vm2073_vm14, %v2034_v20 }
 0x1a2   : > { %v1324_v23 = vpop.f32.mrf.mxu0  ;;  %v1724_v25 = vpop.f32.mrf.mxu1 }
 0x1a3   : > { %v1955_v24 = vmul.f32 0.04761905, %v1324_v23  ;;  %v2035_v26 = vmul.f32 0.04761905, %v1724_v25 }
 0x1a4   : > { %v1326_v27 = vpop.f32.mrf.mxu0  ;;  %v1726_v28 = vpop.f32.mrf.mxu1 }
 0x1a5   : > { %2116 = vst.msk [vmem:[%s3022_s16 + $0x150] sm:$0xff] %vm2073_vm14, %v1955_v24  ;;  %2196 = vst.msk [vmem:[%s3022_s16 + $0x3d0] sm:$0xff] %vm2073_vm14, %v2035_v26 }
 0x1a6   : > { %v1329_v29 = vpop.f32.mrf.mxu0  ;;  %v1729_v31 = vpop.f32.mrf.mxu1 }
 0x1a7   : > { %v1956_v30 = vmul.f32 0.04761905, %v1329_v29  ;;  %v2036_v32 = vmul.f32 0.04761905, %v1729_v31 }
 0x1a8   : > { %v1331_v33 = vpop.f32.mrf.mxu0  ;;  %v1731_v34 = vpop.f32.mrf.mxu1 }
 0x1a9   : > { %2117 = vst.msk [vmem:[%s3022_s16 + $0x158] sm:$0xff] %vm2073_vm14, %v1956_v30  ;;  %2197 = vst.msk [vmem:[%s3022_s16 + $0x3d8] sm:$0xff] %vm2073_vm14, %v2036_v32 }
 0x1aa   : > { %v1334_v35 = vpop.f32.mrf.mxu0  ;;  %v1734_v37 = vpop.f32.mrf.mxu1 }
 0x1ab   : > { %v1957_v36 = vmul.f32 0.04761905, %v1334_v35  ;;  %v2037_v38 = vmul.f32 0.04761905, %v1734_v37 }
 0x1ac   : > { %v1336_v39 = vpop.f32.mrf.mxu0  ;;  %v1736_v40 = vpop.f32.mrf.mxu1 }
 0x1ad   : > { %2118 = vst.msk [vmem:[%s3022_s16 + $0x160] sm:$0xff] %vm2073_vm14, %v1957_v36  ;;  %2198 = vst.msk [vmem:[%s3022_s16 + $0x3e0] sm:$0xff] %vm2073_vm14, %v2037_v38 }
 0x1ae   : > { %v1339_v41 = vpop.f32.mrf.mxu0  ;;  %v1739_v43 = vpop.f32.mrf.mxu1 }
 0x1af   : > { %v1958_v42 = vmul.f32 0.04761905, %v1339_v41  ;;  %v2038_v44 = vmul.f32 0.04761905, %v1739_v43 }
 0x1b0   : > { %v1341_v45 = vpop.f32.mrf.mxu0  ;;  %v1741_v46 = vpop.f32.mrf.mxu1 }
 0x1b1   : > { %2119 = vst.msk [vmem:[%s3022_s16 + $0x168] sm:$0xff] %vm2073_vm14, %v1958_v42  ;;  %2199 = vst.msk [vmem:[%s3022_s16 + $0x3e8] sm:$0xff] %vm2073_vm14, %v2038_v44 }
 0x1b2   : > { %v1344_v47 = vpop.f32.mrf.mxu0  ;;  %v1744_v49 = vpop.f32.mrf.mxu1 }
 0x1b3   : > { %v1959_v48 = vmul.f32 0.04761905, %v1344_v47  ;;  %v2039_v50 = vmul.f32 0.04761905, %v1744_v49 }
 0x1b4   : > { %v1346_v51 = vpop.f32.mrf.mxu0  ;;  %v1746_v52 = vpop.f32.mrf.mxu1 }
 0x1b5   : > { %2120 = vst.msk [vmem:[%s3022_s16 + $0x170] sm:$0xff] %vm2073_vm14, %v1959_v48  ;;  %2200 = vst.msk [vmem:[%s3022_s16 + $0x3f0] sm:$0xff] %vm2073_vm14, %v2039_v50 }
 0x1b6   : > { %v1349_v53 = vpop.f32.mrf.mxu0  ;;  %v1749_v55 = vpop.f32.mrf.mxu1 }
 0x1b7   : > { %v1960_v54 = vmul.f32 0.04761905, %v1349_v53  ;;  %v2040_v56 = vmul.f32 0.04761905, %v1749_v55 }
 0x1b8   : > { %v1351_v57 = vpop.f32.mrf.mxu0  ;;  %v1751_v58 = vpop.f32.mrf.mxu1 }
 0x1b9   : > { %2121 = vst.msk [vmem:[%s3022_s16 + $0x178] sm:$0xff] %vm2073_vm14, %v1960_v54  ;;  %2201 = vst.msk [vmem:[%s3022_s16 + $0x3f8] sm:$0xff] %vm2073_vm14, %v2040_v56 }
 0x1ba   : > { %v1354_v59 = vpop.f32.mrf.mxu0  ;;  %v1754_v61 = vpop.f32.mrf.mxu1 }
 0x1bb   : > { %v1961_v60 = vmul.f32 0.04761905, %v1354_v59  ;;  %v2041_v62 = vmul.f32 0.04761905, %v1754_v61 }
 0x1bc   : > { %v1356_v63 = vpop.f32.mrf.mxu0  ;;  %v1756_v0 = vpop.f32.mrf.mxu1 }
 0x1bd   : > { %2122 = vst.msk [vmem:[%s3022_s16 + $0x180] sm:$0xff] %vm2073_vm14, %v1961_v60  ;;  %2202 = vst.msk [vmem:[%s3022_s16 + $0x400] sm:$0xff] %vm2073_vm14, %v2041_v62 }
 0x1be   : > { %v1359_v1 = vpop.f32.mrf.mxu0  ;;  %v1759_v3 = vpop.f32.mrf.mxu1 }
 0x1bf   : > { %v1962_v2 = vmul.f32 0.04761905, %v1359_v1  ;;  %v2042_v4 = vmul.f32 0.04761905, %v1759_v3 }
 0x1c0   : > { %v1361_v5 = vpop.f32.mrf.mxu0  ;;  %v1761_v6 = vpop.f32.mrf.mxu1 }
 0x1c1   : > { %2123 = vst.msk [vmem:[%s3022_s16 + $0x188] sm:$0xff] %vm2073_vm14, %v1962_v2  ;;  %2203 = vst.msk [vmem:[%s3022_s16 + $0x408] sm:$0xff] %vm2073_vm14, %v2042_v4 }
 0x1c2   : > { %v1364_v7 = vpop.f32.mrf.mxu0  ;;  %v1764_v9 = vpop.f32.mrf.mxu1 }
 0x1c3   : > { %v1963_v8 = vmul.f32 0.04761905, %v1364_v7  ;;  %v2043_v10 = vmul.f32 0.04761905, %v1764_v9 }
 0x1c4   : > { %v1366_v11 = vpop.f32.mrf.mxu0  ;;  %v1766_v12 = vpop.f32.mrf.mxu1 }
 0x1c5   : > { %2124 = vst.msk [vmem:[%s3022_s16 + $0x190] sm:$0xff] %vm2073_vm14, %v1963_v8  ;;  %2204 = vst.msk [vmem:[%s3022_s16 + $0x410] sm:$0xff] %vm2073_vm14, %v2043_v10 }
 0x1c6   : > { %v1369_v13 = vpop.f32.mrf.mxu0  ;;  %v1769_v15 = vpop.f32.mrf.mxu1 }
 0x1c7   : > { %v1964_v14 = vmul.f32 0.04761905, %v1369_v13  ;;  %v2044_v16 = vmul.f32 0.04761905, %v1769_v15 }
 0x1c8   : > { %v1371_v17 = vpop.f32.mrf.mxu0  ;;  %v1771_v18 = vpop.f32.mrf.mxu1 }
 0x1c9   : > { %2125 = vst.msk [vmem:[%s3022_s16 + $0x198] sm:$0xff] %vm2073_vm14, %v1964_v14  ;;  %2205 = vst.msk [vmem:[%s3022_s16 + $0x418] sm:$0xff] %vm2073_vm14, %v2044_v16 }
 0x1ca   : > { %v1374_v19 = vpop.f32.mrf.mxu0  ;;  %v1774_v21 = vpop.f32.mrf.mxu1 }
 0x1cb   : > { %v1965_v20 = vmul.f32 0.04761905, %v1374_v19  ;;  %v2045_v22 = vmul.f32 0.04761905, %v1774_v21 }
 0x1cc   : > { %v1376_v23 = vpop.f32.mrf.mxu0  ;;  %v1776_v24 = vpop.f32.mrf.mxu1 }
 0x1cd   : > { %2126 = vst.msk [vmem:[%s3022_s16 + $0x1a0] sm:$0xff] %vm2073_vm14, %v1965_v20  ;;  %2206 = vst.msk [vmem:[%s3022_s16 + $0x420] sm:$0xff] %vm2073_vm14, %v2045_v22 }
 0x1ce   : > { %v1379_v25 = vpop.f32.mrf.mxu0  ;;  %v1779_v27 = vpop.f32.mrf.mxu1 }
 0x1cf   : > { %v1966_v26 = vmul.f32 0.04761905, %v1379_v25  ;;  %v2046_v28 = vmul.f32 0.04761905, %v1779_v27 }
 0x1d0   : > { %v1381_v29 = vpop.f32.mrf.mxu0  ;;  %v1781_v30 = vpop.f32.mrf.mxu1 }
 0x1d1   : > { %2127 = vst.msk [vmem:[%s3022_s16 + $0x1a8] sm:$0xff] %vm2073_vm14, %v1966_v26  ;;  %2207 = vst.msk [vmem:[%s3022_s16 + $0x428] sm:$0xff] %vm2073_vm14, %v2046_v28 }
 0x1d2   : > { %v1384_v31 = vpop.f32.mrf.mxu0  ;;  %v1784_v33 = vpop.f32.mrf.mxu1 }
 0x1d3   : > { %v1967_v32 = vmul.f32 0.04761905, %v1384_v31  ;;  %v2047_v34 = vmul.f32 0.04761905, %v1784_v33 }
 0x1d4   : > { %v1386_v35 = vpop.f32.mrf.mxu0  ;;  %v1786_v36 = vpop.f32.mrf.mxu1 }
 0x1d5   : > { %2128 = vst.msk [vmem:[%s3022_s16 + $0x1b0] sm:$0xff] %vm2073_vm14, %v1967_v32  ;;  %2208 = vst.msk [vmem:[%s3022_s16 + $0x430] sm:$0xff] %vm2073_vm14, %v2047_v34 }
 0x1d6   : > { %v1389_v37 = vpop.f32.mrf.mxu0  ;;  %v1789_v39 = vpop.f32.mrf.mxu1 }
 0x1d7   : > { %v1968_v38 = vmul.f32 0.04761905, %v1389_v37  ;;  %v2048_v40 = vmul.f32 0.04761905, %v1789_v39 }
 0x1d8   : > { %v1391_v41 = vpop.f32.mrf.mxu0  ;;  %v1791_v42 = vpop.f32.mrf.mxu1 }
 0x1d9   : > { %2129 = vst.msk [vmem:[%s3022_s16 + $0x1b8] sm:$0xff] %vm2073_vm14, %v1968_v38  ;;  %2209 = vst.msk [vmem:[%s3022_s16 + $0x438] sm:$0xff] %vm2073_vm14, %v2048_v40 }
 0x1da   : > { %v1394_v43 = vpop.f32.mrf.mxu0  ;;  %v1794_v45 = vpop.f32.mrf.mxu1 }
 0x1db   : > { %v1969_v44 = vmul.f32 0.04761905, %v1394_v43  ;;  %v2049_v46 = vmul.f32 0.04761905, %v1794_v45 }
 0x1dc   : > { %v1396_v47 = vpop.f32.mrf.mxu0  ;;  %v1796_v48 = vpop.f32.mrf.mxu1 }
 0x1dd   : > { %2130 = vst.msk [vmem:[%s3022_s16 + $0x1c0] sm:$0xff] %vm2073_vm14, %v1969_v44  ;;  %2210 = vst.msk [vmem:[%s3022_s16 + $0x440] sm:$0xff] %vm2073_vm14, %v2049_v46 }
 0x1de   : > { %v1399_v49 = vpop.f32.mrf.mxu0  ;;  %v1799_v51 = vpop.f32.mrf.mxu1 }
 0x1df   : > { %v1970_v50 = vmul.f32 0.04761905, %v1399_v49  ;;  %v2050_v52 = vmul.f32 0.04761905, %v1799_v51 }
 0x1e0   : > { %v1401_v53 = vpop.f32.mrf.mxu0  ;;  %v1801_v54 = vpop.f32.mrf.mxu1 }
 0x1e1   : > { %2131 = vst.msk [vmem:[%s3022_s16 + $0x1c8] sm:$0xff] %vm2073_vm14, %v1970_v50  ;;  %2211 = vst.msk [vmem:[%s3022_s16 + $0x448] sm:$0xff] %vm2073_vm14, %v2050_v52 }
 0x1e2   : > { %v1404_v55 = vpop.f32.mrf.mxu0  ;;  %v1804_v57 = vpop.f32.mrf.mxu1 }
 0x1e3   : > { %v1971_v56 = vmul.f32 0.04761905, %v1404_v55  ;;  %v2051_v58 = vmul.f32 0.04761905, %v1804_v57 }
 0x1e4   : > { %v1406_v59 = vpop.f32.mrf.mxu0  ;;  %v1806_v60 = vpop.f32.mrf.mxu1 }
 0x1e5   : > { %2132 = vst.msk [vmem:[%s3022_s16 + $0x1d0] sm:$0xff] %vm2073_vm14, %v1971_v56  ;;  %2212 = vst.msk [vmem:[%s3022_s16 + $0x450] sm:$0xff] %vm2073_vm14, %v2051_v58 }
 0x1e6   : > { %v1409_v61 = vpop.f32.mrf.mxu0  ;;  %v1809_v63 = vpop.f32.mrf.mxu1 }
 0x1e7   : > { %v1972_v62 = vmul.f32 0.04761905, %v1409_v61  ;;  %v2052_v0 = vmul.f32 0.04761905, %v1809_v63 }
 0x1e8   : > { %v1411_v1 = vpop.f32.mrf.mxu0  ;;  %v1811_v2 = vpop.f32.mrf.mxu1 }
 0x1e9   : > { %2133 = vst.msk [vmem:[%s3022_s16 + $0x1d8] sm:$0xff] %vm2073_vm14, %v1972_v62  ;;  %2213 = vst.msk [vmem:[%s3022_s16 + $0x458] sm:$0xff] %vm2073_vm14, %v2052_v0 }
 0x1ea   : > { %v1414_v3 = vpop.f32.mrf.mxu0  ;;  %v1814_v5 = vpop.f32.mrf.mxu1 }
 0x1eb   : > { %v1973_v4 = vmul.f32 0.04761905, %v1414_v3  ;;  %v2053_v6 = vmul.f32 0.04761905, %v1814_v5 }
 0x1ec   : > { %v1416_v7 = vpop.f32.mrf.mxu0  ;;  %v1816_v8 = vpop.f32.mrf.mxu1 }
 0x1ed   : > { %2134 = vst.msk [vmem:[%s3022_s16 + $0x1e0] sm:$0xff] %vm2073_vm14, %v1973_v4  ;;  %2214 = vst.msk [vmem:[%s3022_s16 + $0x460] sm:$0xff] %vm2073_vm14, %v2053_v6 }
 0x1ee   : > { %v1419_v9 = vpop.f32.mrf.mxu0  ;;  %v1819_v11 = vpop.f32.mrf.mxu1 }
 0x1ef   : > { %v1974_v10 = vmul.f32 0.04761905, %v1419_v9  ;;  %v2054_v12 = vmul.f32 0.04761905, %v1819_v11 }
 0x1f0   : > { %v1421_v13 = vpop.f32.mrf.mxu0  ;;  %v1821_v14 = vpop.f32.mrf.mxu1 }
 0x1f1   : > { %2135 = vst.msk [vmem:[%s3022_s16 + $0x1e8] sm:$0xff] %vm2073_vm14, %v1974_v10  ;;  %2215 = vst.msk [vmem:[%s3022_s16 + $0x468] sm:$0xff] %vm2073_vm14, %v2054_v12 }
 0x1f2   : > { %v1424_v15 = vpop.f32.mrf.mxu0  ;;  %v1824_v17 = vpop.f32.mrf.mxu1 }
 0x1f3   : > { %v1975_v16 = vmul.f32 0.04761905, %v1424_v15  ;;  %v2055_v18 = vmul.f32 0.04761905, %v1824_v17 }
 0x1f4   : > { %v1426_v19 = vpop.f32.mrf.mxu0  ;;  %v1826_v20 = vpop.f32.mrf.mxu1 }
 0x1f5   : > { %2136 = vst.msk [vmem:[%s3022_s16 + $0x1f0] sm:$0xff] %vm2073_vm14, %v1975_v16  ;;  %2216 = vst.msk [vmem:[%s3022_s16 + $0x470] sm:$0xff] %vm2073_vm14, %v2055_v18 }
 0x1f6   : > { %v1429_v21 = vpop.f32.mrf.mxu0  ;;  %v1829_v23 = vpop.f32.mrf.mxu1 }
 0x1f7   : > { %v1976_v22 = vmul.f32 0.04761905, %v1429_v21  ;;  %v2056_v24 = vmul.f32 0.04761905, %v1829_v23 }
 0x1f8   : > { %v1431_v25 = vpop.f32.mrf.mxu0  ;;  %v1831_v26 = vpop.f32.mrf.mxu1 }
 0x1f9   : > { %2137 = vst.msk [vmem:[%s3022_s16 + $0x1f8] sm:$0xff] %vm2073_vm14, %v1976_v22  ;;  %2217 = vst.msk [vmem:[%s3022_s16 + $0x478] sm:$0xff] %vm2073_vm14, %v2056_v24 }
 0x1fa   : > { %v1434_v27 = vpop.f32.mrf.mxu0  ;;  %v1834_v29 = vpop.f32.mrf.mxu1 }
 0x1fb   : > { %v1977_v28 = vmul.f32 0.04761905, %v1434_v27  ;;  %v2057_v30 = vmul.f32 0.04761905, %v1834_v29 }
 0x1fc   : > { %v1436_v31 = vpop.f32.mrf.mxu0  ;;  %v1836_v32 = vpop.f32.mrf.mxu1 }
 0x1fd   : > { %2138 = vst.msk [vmem:[%s3022_s16 + $0x200] sm:$0xff] %vm2073_vm14, %v1977_v28  ;;  %2218 = vst.msk [vmem:[%s3022_s16 + $0x480] sm:$0xff] %vm2073_vm14, %v2057_v30 }
 0x1fe   : > { %v1439_v33 = vpop.f32.mrf.mxu0  ;;  %v1839_v35 = vpop.f32.mrf.mxu1 }
 0x1ff   : > { %v1978_v34 = vmul.f32 0.04761905, %v1439_v33  ;;  %v2058_v36 = vmul.f32 0.04761905, %v1839_v35 }
 0x200   : > { %v1441_v37 = vpop.f32.mrf.mxu0  ;;  %v1841_v38 = vpop.f32.mrf.mxu1 }
 0x201   : > { %2139 = vst.msk [vmem:[%s3022_s16 + $0x208] sm:$0xff] %vm2073_vm14, %v1978_v34  ;;  %2219 = vst.msk [vmem:[%s3022_s16 + $0x488] sm:$0xff] %vm2073_vm14, %v2058_v36 }
 0x202   : > { %v1444_v39 = vpop.f32.mrf.mxu0  ;;  %v1844_v41 = vpop.f32.mrf.mxu1 }
 0x203   : > { %v1979_v40 = vmul.f32 0.04761905, %v1444_v39  ;;  %v2059_v42 = vmul.f32 0.04761905, %v1844_v41 }
 0x204   : > { %v1446_v43 = vpop.f32.mrf.mxu0  ;;  %v1846_v44 = vpop.f32.mrf.mxu1 }
 0x205   : > { %2140 = vst.msk [vmem:[%s3022_s16 + $0x210] sm:$0xff] %vm2073_vm14, %v1979_v40  ;;  %2220 = vst.msk [vmem:[%s3022_s16 + $0x490] sm:$0xff] %vm2073_vm14, %v2059_v42 }
 0x206   : > { %v1449_v45 = vpop.f32.mrf.mxu0  ;;  %v1849_v47 = vpop.f32.mrf.mxu1 }
 0x207   : > { %v1980_v46 = vmul.f32 0.04761905, %v1449_v45  ;;  %v2060_v48 = vmul.f32 0.04761905, %v1849_v47 }
 0x208   : > { %v1451_v49 = vpop.f32.mrf.mxu0  ;;  %v1851_v50 = vpop.f32.mrf.mxu1 }
 0x209   : > { %2141 = vst.msk [vmem:[%s3022_s16 + $0x218] sm:$0xff] %vm2073_vm14, %v1980_v46  ;;  %2221 = vst.msk [vmem:[%s3022_s16 + $0x498] sm:$0xff] %vm2073_vm14, %v2060_v48 }
 0x20a   : > { %v1454_v51 = vpop.f32.mrf.mxu0  ;;  %v1854_v53 = vpop.f32.mrf.mxu1 }
 0x20b   : > { %v1981_v52 = vmul.f32 0.04761905, %v1454_v51  ;;  %v2061_v54 = vmul.f32 0.04761905, %v1854_v53 }
 0x20c   : > { %v1456_v55 = vpop.f32.mrf.mxu0  ;;  %v1856_v56 = vpop.f32.mrf.mxu1 }
 0x20d   : > { %2142 = vst.msk [vmem:[%s3022_s16 + $0x220] sm:$0xff] %vm2073_vm14, %v1981_v52  ;;  %2222 = vst.msk [vmem:[%s3022_s16 + $0x4a0] sm:$0xff] %vm2073_vm14, %v2061_v54 }
 0x20e   : > { %v1459_v57 = vpop.f32.mrf.mxu0  ;;  %v1859_v59 = vpop.f32.mrf.mxu1 }
 0x20f   : > { %v1982_v58 = vmul.f32 0.04761905, %v1459_v57  ;;  %v2062_v60 = vmul.f32 0.04761905, %v1859_v59 }
 0x210   : > { %v1461_v61 = vpop.f32.mrf.mxu0  ;;  %v1861_v62 = vpop.f32.mrf.mxu1 }
 0x211   : > { %2143 = vst.msk [vmem:[%s3022_s16 + $0x228] sm:$0xff] %vm2073_vm14, %v1982_v58  ;;  %2223 = vst.msk [vmem:[%s3022_s16 + $0x4a8] sm:$0xff] %vm2073_vm14, %v2062_v60 }
 0x212   : > { %v1464_v63 = vpop.f32.mrf.mxu0  ;;  %v1864_v1 = vpop.f32.mrf.mxu1 }
 0x213   : > { %v1983_v0 = vmul.f32 0.04761905, %v1464_v63  ;;  %v2063_v2 = vmul.f32 0.04761905, %v1864_v1 }
 0x214   : > { %v1466_v3 = vpop.f32.mrf.mxu0  ;;  %v1866_v4 = vpop.f32.mrf.mxu1 }
 0x215   : > { %2144 = vst.msk [vmem:[%s3022_s16 + $0x230] sm:$0xff] %vm2073_vm14, %v1983_v0  ;;  %2224 = vst.msk [vmem:[%s3022_s16 + $0x4b0] sm:$0xff] %vm2073_vm14, %v2063_v2 }
 0x216   : > { %v1469_v5 = vpop.f32.mrf.mxu0  ;;  %v1869_v7 = vpop.f32.mrf.mxu1 }
 0x217   : > { %v1984_v6 = vmul.f32 0.04761905, %v1469_v5  ;;  %v2064_v8 = vmul.f32 0.04761905, %v1869_v7 }
 0x218   : > { %v1471_v9 = vpop.f32.mrf.mxu0  ;;  %v1871_v10 = vpop.f32.mrf.mxu1 }
 0x219   : > { %2145 = vst.msk [vmem:[%s3022_s16 + $0x238] sm:$0xff] %vm2073_vm14, %v1984_v6  ;;  %2225 = vst.msk [vmem:[%s3022_s16 + $0x4b8] sm:$0xff] %vm2073_vm14, %v2064_v8 }
 0x21a   : > { %v1474_v11 = vpop.f32.mrf.mxu0  ;;  %v1874_v13 = vpop.f32.mrf.mxu1 }
 0x21b   : > { %v1985_v12 = vmul.f32 0.04761905, %v1474_v11  ;;  %v2065_v14 = vmul.f32 0.04761905, %v1874_v13 }
 0x21c   : > { %v1476_v15 = vpop.f32.mrf.mxu0  ;;  %v1876_v16 = vpop.f32.mrf.mxu1 }
 0x21d   : > { %2146 = vst.msk [vmem:[%s3022_s16 + $0x240] sm:$0xff] %vm2073_vm14, %v1985_v12  ;;  %2226 = vst.msk [vmem:[%s3022_s16 + $0x4c0] sm:$0xff] %vm2073_vm14, %v2065_v14 }
 0x21e   : > { %v1479_v17 = vpop.f32.mrf.mxu0  ;;  %v1879_v19 = vpop.f32.mrf.mxu1 }
 0x21f   : > { %v1986_v18 = vmul.f32 0.04761905, %v1479_v17  ;;  %v2066_v20 = vmul.f32 0.04761905, %v1879_v19 }
 0x220   : > { %v1481_v21 = vpop.f32.mrf.mxu0  ;;  %v1881_v22 = vpop.f32.mrf.mxu1 }
 0x221   : > { %2147 = vst.msk [vmem:[%s3022_s16 + $0x248] sm:$0xff] %vm2073_vm14, %v1986_v18  ;;  %2227 = vst.msk [vmem:[%s3022_s16 + $0x4c8] sm:$0xff] %vm2073_vm14, %v2066_v20 }
 0x222   : > { %v1484_v23 = vpop.f32.mrf.mxu0  ;;  %v1884_v25 = vpop.f32.mrf.mxu1 }
 0x223   : > { %v1987_v24 = vmul.f32 0.04761905, %v1484_v23  ;;  %v2067_v26 = vmul.f32 0.04761905, %v1884_v25 }
 0x224   : > { %v1486_v27 = vpop.f32.mrf.mxu0  ;;  %v1886_v28 = vpop.f32.mrf.mxu1 }
 0x225   : > { %2148 = vst.msk [vmem:[%s3022_s16 + $0x250] sm:$0xff] %vm2073_vm14, %v1987_v24  ;;  %2228 = vst.msk [vmem:[%s3022_s16 + $0x4d0] sm:$0xff] %vm2073_vm14, %v2067_v26 }
 0x226   : > { %v1489_v29 = vpop.f32.mrf.mxu0  ;;  %v1889_v31 = vpop.f32.mrf.mxu1 }
 0x227   : > { %v1988_v30 = vmul.f32 0.04761905, %v1489_v29  ;;  %v2068_v32 = vmul.f32 0.04761905, %v1889_v31 }
 0x228   : > { %v1491_v33 = vpop.f32.mrf.mxu0  ;;  %v1891_v34 = vpop.f32.mrf.mxu1 }
 0x229   : > { %2149 = vst.msk [vmem:[%s3022_s16 + $0x258] sm:$0xff] %vm2073_vm14, %v1988_v30  ;;  %2229 = vst.msk [vmem:[%s3022_s16 + $0x4d8] sm:$0xff] %vm2073_vm14, %v2068_v32 }
 0x22a   : > { %v1494_v35 = vpop.f32.mrf.mxu0  ;;  %v1894_v37 = vpop.f32.mrf.mxu1 }
 0x22b   : > { %v1989_v36 = vmul.f32 0.04761905, %v1494_v35  ;;  %v2069_v38 = vmul.f32 0.04761905, %v1894_v37 }
 0x22c   : > { %v1496_v39 = vpop.f32.mrf.mxu0  ;;  %v1896_v40 = vpop.f32.mrf.mxu1 }
 0x22d   : > { %2150 = vst.msk [vmem:[%s3022_s16 + $0x260] sm:$0xff] %vm2073_vm14, %v1989_v36  ;;  %2230 = vst.msk [vmem:[%s3022_s16 + $0x4e0] sm:$0xff] %vm2073_vm14, %v2069_v38 }
 0x22e   : > { %v1499_v41 = vpop.f32.mrf.mxu0  ;;  %v1899_v43 = vpop.f32.mrf.mxu1 }
 0x22f   : > { %v1990_v42 = vmul.f32 0.04761905, %v1499_v41  ;;  %v2070_v44 = vmul.f32 0.04761905, %v1899_v43 }
 0x230   : > { %v1501_v45 = vpop.f32.mrf.mxu0  ;;  %v1901_v46 = vpop.f32.mrf.mxu1 }
 0x231   : > { %2151 = vst.msk [vmem:[%s3022_s16 + $0x268] sm:$0xff] %vm2073_vm14, %v1990_v42  ;;  %2231 = vst.msk [vmem:[%s3022_s16 + $0x4e8] sm:$0xff] %vm2073_vm14, %v2070_v44 }
 0x232   : > { %v1504_v47 = vpop.f32.mrf.mxu0  ;;  %v1904_v49 = vpop.f32.mrf.mxu1 }
 0x233   : > { %v1991_v48 = vmul.f32 0.04761905, %v1504_v47  ;;  %v2071_v50 = vmul.f32 0.04761905, %v1904_v49 }
 0x234   : > { %v1506_v51 = vpop.f32.mrf.mxu0  ;;  %v1906_v52 = vpop.f32.mrf.mxu1 }
 0x235   : > { %2152 = vst.msk [vmem:[%s3022_s16 + $0x270] sm:$0xff] %vm2073_vm14, %v1991_v48  ;;  %2232 = vst.msk [vmem:[%s3022_s16 + $0x4f0] sm:$0xff] %vm2073_vm14, %v2071_v50 }
 0x236   : > { %v1509_v53 = vpop.f32.mrf.mxu0  ;;  %v1909_v55 = vpop.f32.mrf.mxu1 }
 0x237   : > { %v1992_v54 = vmul.f32 0.04761905, %v1509_v53  ;;  %v2072_v56 = vmul.f32 0.04761905, %v1909_v55 }
 0x238   : > { %v1511_v57 = vpop.f32.mrf.mxu0  ;;  %v1911_v58 = vpop.f32.mrf.mxu1 }
 0x239   : > { %2153 = vst.msk [vmem:[%s3022_s16 + $0x278] sm:$0xff] %vm2073_vm14, %v1992_v54  ;;  %2233 = vst.msk [vmem:[%s3022_s16 + $0x4f8] sm:$0xff] %vm2073_vm14, %v2072_v56 }
 0x23a PF: > { %s11_s6 = sadd.s32 1, %s2553_s6  }
 0x23b   : > { %p8_p4 = scmp.ge.s32.totalorder %s11_s6, 4  }
 0x23d   :  { %10 = sbr.rel (!%p8_p4) target bundleno = 1 (0x1), region = 54 }

</bundles_post_ra>
